<compile_context>
chip_gen: v6e
topology: v6e:2x2x1
jax: 0.10.0
libtpu: 0.0.40
codegen_flags: <defaults>
</compile_context>

<pallas_src>
import jax
import jax.numpy as jnp
from jax.experimental import pallas as pl
from jax.experimental.pallas import tpu as pltpu


def dem_localization_kernel(a_ref, x_ref,
                            w1_ref, b1_ref, w2_ref, b2_ref,
                            w3_ref, b3_ref, w4_ref, b4_ref,
                            wr_ref, wd_ref, br_ref, bd_ref,
                            scores_ref, dem_ref):
    bf16 = jnp.bfloat16
    f32 = jnp.float32

    a_hat = a_ref[...]                    # (Mt, Mt) bf16 block-diagonal (A + I)

    # ---- GIN layer 1: (A+I) @ x, then MLP [T -> H -> H] (bf16 MXU, f32 accum) ----
    h = jnp.dot(a_hat, x_ref[...].astype(bf16), preferred_element_type=f32)
    h = jnp.dot(h.astype(bf16), w1_ref[...], preferred_element_type=f32) + b1_ref[...]
    h = jnp.maximum(h, 0.0)
    h = jnp.dot(h.astype(bf16), w2_ref[...], preferred_element_type=f32) + b2_ref[...]
    h = jnp.maximum(h, 0.0)               # BasicGNN inter-layer activation

    # ---- GIN layer 2: (A+I) @ h, then MLP [H -> L -> L] ----
    h = jnp.dot(a_hat, h.astype(bf16), preferred_element_type=f32)
    h = jnp.dot(h.astype(bf16), w3_ref[...], preferred_element_type=f32) + b3_ref[...]
    h = jnp.maximum(h, 0.0)
    feat = jnp.dot(h.astype(bf16), w4_ref[...], preferred_element_type=f32) + b4_ref[...]  # (Mt, L)

    # ---- regional scores: Linear(L, 1) as VPU mul + lane (XLU) reduce ----
    scores_ref[...] = jnp.sum(feat * wr_ref[...], axis=-1, keepdims=True) + br_ref[0, 0]

    # ---- dementia prediction: sigmoid(flatten(per-sample feat) @ Wd + bd) ----
    spt = dem_ref.shape[0]                # samples in this tile
    n_pad, lat = wd_ref.shape
    feat3 = feat.reshape(spt, n_pad, lat)                 # free leading-axis split
    contrib = jnp.sum(feat3 * wd_ref[...], axis=1)        # (spt, L): sum over nodes
    logit = jnp.sum(contrib, axis=-1, keepdims=True) + bd_ref[0, 0]   # (spt, 1)
    dem_ref[...] = jax.nn.sigmoid(logit)


def dem_localization(adj, eeg_nodes, params):
    """adj: (N, N) dense adjacency (no self loops); eeg_nodes: (B, N, T).

    Returns (dementia_pred (B,1,1), region_scores (B,N,1)): one DemLocalization
    forward per EEG window, all windows sharing the montage graph and weights.
    """
    B, N, T = eeg_nodes.shape
    H = params["w2"].shape[0]
    L = params["w4"].shape[1]
    # wd must be the torch (1, N*L) dementia_pred weight reshaped row-major to (N, L).
    assert params["wd"].shape == (N, L)

    f32, bf16 = jnp.float32, jnp.bfloat16
    Np = ((N + 7) // 8) * 8               # pad node axis to a sublane multiple

    # Batch tiling: fold samples into the matmul M dimension. Small batches collapse
    # to a single grid step (no per-step overhead / pipeline bubbles); large batches
    # get tiles with >=128 MXU rows per step.
    spt = max(1, -(-128 // Np))           # samples per grid step (target >= 128 rows)
    if spt >= B:
        spt = B
    else:
        spt = min(((spt + 7) // 8) * 8, B)   # keep dementia-output block sublane aligned
    num_tiles = -(-B // spt)
    Bp = num_tiles * spt
    Mt = spt * Np                          # stacked rows per grid step

    # Fold the self loop and build the per-tile block-diagonal aggregation matrix
    # (identical for every tile -> constant, VMEM-resident).  Entries are 0/1/2,
    # exact in bf16, so the aggregation uses the fast bf16 MXU path.
    a_hat = (adj + jnp.eye(N, dtype=adj.dtype)).astype(f32)
    a_hat = jnp.pad(a_hat, ((0, Np - N), (0, Np - N)))
    a_tile = jnp.kron(jnp.eye(spt, dtype=f32), a_hat).astype(bf16)      # (Mt, Mt)

    # Stack the batch into the M dimension: (Bp*Np, T).
    x = eeg_nodes.astype(f32)
    x = jnp.pad(x, ((0, Bp - B), (0, Np - N), (0, 0))).reshape(Bp * Np, T)

    # Padded node rows of `feat` are nonzero (biases propagate through the MLP);
    # zeroed padded rows of wd keep them out of the dementia logit.  Padded
    # region scores / padded samples are garbage and sliced off below.
    wd = jnp.pad(params["wd"].astype(f32), ((0, Np - N), (0, 0)))        # (Np, L)

    inputs = (
        a_tile, x,
        params["w1"].astype(bf16), params["b1"].astype(f32),
        params["w2"].astype(bf16), params["b2"].astype(f32),
        params["w3"].astype(bf16), params["b3"].astype(f32),
        params["w4"].astype(bf16), params["b4"].astype(f32),
        params["wr"].astype(f32), wd,
        params["br"].astype(f32).reshape(1, 1), params["bd"].astype(f32).reshape(1, 1),
    )

    const2 = lambda g: (0, 0)              # same block every step -> VMEM resident

    def resident(shape):                   # constant blocks: single buffer, no rotation
        return pl.BlockSpec(shape, const2, pipeline_mode=pl.Buffered(1))

    in_specs = [
        resident((Mt, Mt)),                                   # block-diag A_hat
        pl.BlockSpec((Mt, T), lambda g: (g, 0)),              # x rows for this tile
        resident((T, H)), resident((1, H)),                   # w1, b1
        resident((H, H)), resident((1, H)),                   # w2, b2
        resident((H, L)), resident((1, L)),                   # w3, b3
        resident((L, L)), resident((1, L)),                   # w4, b4
        resident((1, L)), resident((Np, L)),                  # wr, wd
        pl.BlockSpec(memory_space=pltpu.MemorySpace.SMEM),    # br (scalar)
        pl.BlockSpec(memory_space=pltpu.MemorySpace.SMEM),    # bd (scalar)
    ]
    out_specs = (
        pl.BlockSpec((Mt, 1), lambda g: (g, 0)),              # per-node region scores
        pl.BlockSpec((spt, 1), lambda g: (g, 0)),             # per-sample dementia pred
    )
    out_shape = (
        jax.ShapeDtypeStruct((Bp * Np, 1), f32),
        jax.ShapeDtypeStruct((Bp, 1), f32),
    )

    flops_tile = 2 * (Mt * Mt * T + Mt * T * H + Mt * H * H
                      + Mt * Mt * H + Mt * H * L + Mt * L * L + 2 * Mt * L)
    bytes_in = sum(int(a.size) * a.dtype.itemsize for a in inputs)
    cost = pl.CostEstimate(
        flops=num_tiles * flops_tile,
        transcendentals=Bp,
        bytes_accessed=int(bytes_in + (Bp * Np + Bp) * 4),
    )

    scores_flat, dem_flat = pl.pallas_call(
        dem_localization_kernel,
        grid=(num_tiles,),
        in_specs=in_specs,
        out_specs=out_specs,
        out_shape=out_shape,
        compiler_params=pltpu.CompilerParams(
            dimension_semantics=("parallel",) if num_tiles > 1 else ("arbitrary",)),
        cost_estimate=cost,
    )(*inputs)

    region_scores = scores_flat.reshape(Bp, Np, 1)[:B, :N, :]   # (B, N, 1)
    dementia_pred = dem_flat[:B].reshape(B, 1, 1)               # (B, 1, 1)
    return dementia_pred, region_scores


def _reference(adj_hat, x, p):
    """Plain-JAX reference of the exact math the kernel performs (bf16 MXU, f32 accum)."""
    bf16, f32 = jnp.bfloat16, jnp.float32

    def mm(a, b):
        return jnp.dot(a.astype(bf16), b.astype(bf16), preferred_element_type=f32)

    h = mm(adj_hat, x)
    h = jnp.maximum(mm(h, p["w1"]) + p["b1"], 0.0)
    h = jnp.maximum(mm(h, p["w2"]) + p["b2"], 0.0)
    h = mm(adj_hat, h)
    h = jnp.maximum(mm(h, p["w3"]) + p["b3"], 0.0)
    feat = mm(h, p["w4"]) + p["b4"]
    scores = jnp.sum(feat * p["wr"], axis=-1, keepdims=True) + p["br"]
    logit = jnp.sum(feat * p["wd"]) + p["bd"]
    return jax.nn.sigmoid(logit), scores


if __name__ == "__main__":
    # Small, deterministic configuration consistent with the module.
    B = 4      # batch of EEG windows sharing the montage (graph) and weights
    N = 8      # num_eeg_channels
    T = 64     # num_eeg_timesteps
    H = 512    # GIN hidden_channels (fixed in module __init__)
    L = 32     # latent_features

    key = jax.random.PRNGKey(0)
    ks = jax.random.split(key, 16)

    def init(k, shape, scale=0.05):
        return (scale * jax.random.normal(k, shape)).astype(jnp.float32)

    params = {
        # GINConv #1 MLP: [T, H, H]
        "w1": init(ks[0], (T, H)), "b1": init(ks[1], (1, H)),
        "w2": init(ks[2], (H, H)), "b2": init(ks[3], (1, H)),
        # GINConv #2 MLP: [H, L, L]
        "w3": init(ks[4], (H, L)), "b3": init(ks[5], (1, L)),
        "w4": init(ks[6], (L, L)), "b4": init(ks[7], (1, L)),
        # regional_scores: Linear(L, 1) — weight in torch layout (1, L)
        "wr": init(ks[8], (1, L)), "br": init(ks[9], (1, 1)),
        # dementia_pred: Linear(N*L, 1) — (1, N*L) weight reshaped row-major to (N, L)
        "wd": init(ks[10], (N, L)), "bd": init(ks[11], (1, 1)),
    }

    # eeg_nodes: (B, N, T) node features (one feature row per EEG channel).
    eeg_nodes = jax.random.normal(ks[12], (B, N, T)).astype(jnp.float32)

    # eeg_idx: (2, E) bidirectional ring graph over the N channels.
    src = jnp.concatenate([jnp.arange(N), (jnp.arange(N) + 1) % N])
    dst = jnp.concatenate([(jnp.arange(N) + 1) % N, jnp.arange(N)])
    eeg_idx = jnp.stack([src, dst]).astype(jnp.int32)

    # Dense adjacency for sum-aggregation: A[dst, src] = 1  (glue, plain JAX).
    adj = jnp.zeros((N, N), jnp.float32).at[eeg_idx[1], eeg_idx[0]].add(1.0)

    dem_pred, region_scores = dem_localization(adj, eeg_nodes, params)
    jax.block_until_ready((dem_pred, region_scores))

    assert dem_pred.shape == (B, 1, 1) and region_scores.shape == (B, N, 1)

    adj_hat = adj + jnp.eye(N, dtype=adj.dtype)
    for b in range(B):
        ref_dem, ref_scores = _reference(adj_hat, eeg_nodes[b], params)
        assert ref_dem.shape == (1, 1) and ref_scores.shape == (N, 1)
        assert jnp.allclose(dem_pred[b], ref_dem, atol=2e-4, rtol=2e-3)
        assert jnp.allclose(region_scores[b], ref_scores, atol=2e-4, rtol=2e-3)

    print("KERNEL_OK")
</pallas_src>

<mosaic_0001>
module attributes {stable_mosaic.version = 11 : i64} {
  func.func @dem_localization_kernel(%arg0: i32, %arg1: memref<32x32xbf16, #tpu.memory_space<vmem>>, %arg2: memref<32x64xf32, #tpu.memory_space<vmem>>, %arg3: memref<64x512xbf16, #tpu.memory_space<vmem>>, %arg4: memref<1x512xf32, #tpu.memory_space<vmem>>, %arg5: memref<512x512xbf16, #tpu.memory_space<vmem>>, %arg6: memref<1x512xf32, #tpu.memory_space<vmem>>, %arg7: memref<512x32xbf16, #tpu.memory_space<vmem>>, %arg8: memref<1x32xf32, #tpu.memory_space<vmem>>, %arg9: memref<32x32xbf16, #tpu.memory_space<vmem>>, %arg10: memref<1x32xf32, #tpu.memory_space<vmem>>, %arg11: memref<1x32xf32, #tpu.memory_space<vmem>>, %arg12: memref<8x32xf32, #tpu.memory_space<vmem>>, %arg13: memref<1x1xf32, #tpu.memory_space<smem>>, %arg14: memref<1x1xf32, #tpu.memory_space<smem>>, %arg15: memref<32x1xf32, #tpu.memory_space<vmem>>, %arg16: memref<4x1xf32, #tpu.memory_space<vmem>>) attributes {dimension_semantics = [#tpu.dimension_semantics<arbitrary>], iteration_bounds = array<i64: 1>, scalar_prefetch = 0 : i64, scratch_operands = 0 : i64, tpu.core_type = #tpu.core_type<tc>, window_params = [{pipeline_mode = #tpu.pipeline_mode<synchronous>, transform_indices = @transform_0, window_bounds = array<i64: 32, 32>}, {transform_indices = @transform_1, window_bounds = array<i64: 32, 64>}, {pipeline_mode = #tpu.pipeline_mode<synchronous>, transform_indices = @transform_2, window_bounds = array<i64: 64, 512>}, {pipeline_mode = #tpu.pipeline_mode<synchronous>, transform_indices = @transform_3, window_bounds = array<i64: 1, 512>}, {pipeline_mode = #tpu.pipeline_mode<synchronous>, transform_indices = @transform_4, window_bounds = array<i64: 512, 512>}, {pipeline_mode = #tpu.pipeline_mode<synchronous>, transform_indices = @transform_5, window_bounds = array<i64: 1, 512>}, {pipeline_mode = #tpu.pipeline_mode<synchronous>, transform_indices = @transform_6, window_bounds = array<i64: 512, 32>}, {pipeline_mode = #tpu.pipeline_mode<synchronous>, transform_indices = @transform_7, window_bounds = array<i64: 1, 32>}, {pipeline_mode = #tpu.pipeline_mode<synchronous>, transform_indices = @transform_8, window_bounds = array<i64: 32, 32>}, {pipeline_mode = #tpu.pipeline_mode<synchronous>, transform_indices = @transform_9, window_bounds = array<i64: 1, 32>}, {pipeline_mode = #tpu.pipeline_mode<synchronous>, transform_indices = @transform_10, window_bounds = array<i64: 1, 32>}, {pipeline_mode = #tpu.pipeline_mode<synchronous>, transform_indices = @transform_11, window_bounds = array<i64: 8, 32>}, {transform_indices = @transform_12, window_bounds = array<i64: 1, 1>}, {transform_indices = @transform_13, window_bounds = array<i64: 1, 1>}, {transform_indices = @transform_14, window_bounds = array<i64: 32, 1>}, {transform_indices = @transform_15, window_bounds = array<i64: 4, 1>}]} {
    %c0 = arith.constant 0 : index
    %c0_0 = arith.constant 0 : index
    %0 = vector.load %arg1[%c0, %c0_0] : memref<32x32xbf16, #tpu.memory_space<vmem>>, vector<32x32xbf16>
    %c0_1 = arith.constant 0 : index
    %c0_2 = arith.constant 0 : index
    %1 = vector.load %arg2[%c0_1, %c0_2] : memref<32x64xf32, #tpu.memory_space<vmem>>, vector<32x64xf32>
    %2 = arith.truncf %1 : vector<32x64xf32> to vector<32x64xbf16>
    %cst = arith.constant dense<0.000000e+00> : vector<32x64xf32>
    %3 = tpu.matmul %0, %2, %cst {dimension_numbers = #tpu.dot_dimension_numbers<[1], [0], [0], [1], [0, 0, 1, 1], [], []>} : vector<32x32xbf16>, vector<32x64xbf16>, vector<32x64xf32> -> vector<32x64xf32>
    %4 = arith.truncf %3 : vector<32x64xf32> to vector<32x64xbf16>
    %c0_3 = arith.constant 0 : index
    %c0_4 = arith.constant 0 : index
    %5 = vector.load %arg3[%c0_3, %c0_4] : memref<64x512xbf16, #tpu.memory_space<vmem>>, vector<64x512xbf16>
    %cst_5 = arith.constant dense<0.000000e+00> : vector<32x512xf32>
    %6 = tpu.matmul %4, %5, %cst_5 {dimension_numbers = #tpu.dot_dimension_numbers<[1], [0], [0], [1], [0, 0, 1, 1], [], []>} : vector<32x64xbf16>, vector<64x512xbf16>, vector<32x512xf32> -> vector<32x512xf32>
    %c0_6 = arith.constant 0 : index
    %c0_7 = arith.constant 0 : index
    %7 = vector.load %arg4[%c0_6, %c0_7] : memref<1x512xf32, #tpu.memory_space<vmem>>, vector<1x512xf32>
    %8 = vector.broadcast %7 : vector<1x512xf32> to vector<32x512xf32>
    %9 = arith.addf %6, %8 : vector<32x512xf32>
    %cst_8 = arith.constant 0.000000e+00 : f32
    %10 = vector.broadcast %cst_8 : f32 to vector<32x512xf32>
    %11 = arith.maximumf %9, %10 : vector<32x512xf32>
    %12 = arith.truncf %11 : vector<32x512xf32> to vector<32x512xbf16>
    %c0_9 = arith.constant 0 : index
    %c0_10 = arith.constant 0 : index
    %13 = vector.load %arg5[%c0_9, %c0_10] : memref<512x512xbf16, #tpu.memory_space<vmem>>, vector<512x512xbf16>
    %cst_11 = arith.constant dense<0.000000e+00> : vector<32x512xf32>
    %14 = tpu.matmul %12, %13, %cst_11 {dimension_numbers = #tpu.dot_dimension_numbers<[1], [0], [0], [1], [0, 0, 1, 1], [], []>} : vector<32x512xbf16>, vector<512x512xbf16>, vector<32x512xf32> -> vector<32x512xf32>
    %c0_12 = arith.constant 0 : index
    %c0_13 = arith.constant 0 : index
    %15 = vector.load %arg6[%c0_12, %c0_13] : memref<1x512xf32, #tpu.memory_space<vmem>>, vector<1x512xf32>
    %16 = vector.broadcast %15 : vector<1x512xf32> to vector<32x512xf32>
    %17 = arith.addf %14, %16 : vector<32x512xf32>
    %cst_14 = arith.constant 0.000000e+00 : f32
    %18 = vector.broadcast %cst_14 : f32 to vector<32x512xf32>
    %19 = arith.maximumf %17, %18 : vector<32x512xf32>
    %20 = arith.truncf %19 : vector<32x512xf32> to vector<32x512xbf16>
    %cst_15 = arith.constant dense<0.000000e+00> : vector<32x512xf32>
    %21 = tpu.matmul %0, %20, %cst_15 {dimension_numbers = #tpu.dot_dimension_numbers<[1], [0], [0], [1], [0, 0, 1, 1], [], []>} : vector<32x32xbf16>, vector<32x512xbf16>, vector<32x512xf32> -> vector<32x512xf32>
    %22 = arith.truncf %21 : vector<32x512xf32> to vector<32x512xbf16>
    %c0_16 = arith.constant 0 : index
    %c0_17 = arith.constant 0 : index
    %23 = vector.load %arg7[%c0_16, %c0_17] : memref<512x32xbf16, #tpu.memory_space<vmem>>, vector<512x32xbf16>
    %cst_18 = arith.constant dense<0.000000e+00> : vector<32x32xf32>
    %24 = tpu.matmul %22, %23, %cst_18 {dimension_numbers = #tpu.dot_dimension_numbers<[1], [0], [0], [1], [0, 0, 1, 1], [], []>} : vector<32x512xbf16>, vector<512x32xbf16>, vector<32x32xf32> -> vector<32x32xf32>
    %c0_19 = arith.constant 0 : index
    %c0_20 = arith.constant 0 : index
    %25 = vector.load %arg8[%c0_19, %c0_20] : memref<1x32xf32, #tpu.memory_space<vmem>>, vector<1x32xf32>
    %26 = vector.broadcast %25 : vector<1x32xf32> to vector<32x32xf32>
    %27 = arith.addf %24, %26 : vector<32x32xf32>
    %cst_21 = arith.constant 0.000000e+00 : f32
    %28 = vector.broadcast %cst_21 : f32 to vector<32x32xf32>
    %29 = arith.maximumf %27, %28 : vector<32x32xf32>
    %30 = arith.truncf %29 : vector<32x32xf32> to vector<32x32xbf16>
    %c0_22 = arith.constant 0 : index
    %c0_23 = arith.constant 0 : index
    %31 = vector.load %arg9[%c0_22, %c0_23] : memref<32x32xbf16, #tpu.memory_space<vmem>>, vector<32x32xbf16>
    %cst_24 = arith.constant dense<0.000000e+00> : vector<32x32xf32>
    %32 = tpu.matmul %30, %31, %cst_24 {dimension_numbers = #tpu.dot_dimension_numbers<[1], [0], [0], [1], [0, 0, 1, 1], [], []>} : vector<32x32xbf16>, vector<32x32xbf16>, vector<32x32xf32> -> vector<32x32xf32>
    %c0_25 = arith.constant 0 : index
    %c0_26 = arith.constant 0 : index
    %33 = vector.load %arg10[%c0_25, %c0_26] : memref<1x32xf32, #tpu.memory_space<vmem>>, vector<1x32xf32>
    %34 = vector.broadcast %33 : vector<1x32xf32> to vector<32x32xf32>
    %35 = arith.addf %32, %34 : vector<32x32xf32>
    %c0_27 = arith.constant 0 : index
    %c0_28 = arith.constant 0 : index
    %36 = vector.load %arg11[%c0_27, %c0_28] : memref<1x32xf32, #tpu.memory_space<vmem>>, vector<1x32xf32>
    %37 = vector.broadcast %36 : vector<1x32xf32> to vector<32x32xf32>
    %38 = arith.mulf %35, %37 : vector<32x32xf32>
    %cst_29 = arith.constant dense<0.000000e+00> : vector<32xf32>
    %39 = vector.multi_reduction <add>, %38, %cst_29 [1] : vector<32x32xf32> to vector<32xf32>
    %40 = vector.shape_cast %39 : vector<32xf32> to vector<32x1xf32>
    %c0_30 = arith.constant 0 : index
    %c0_31 = arith.constant 0 : index
    %41 = memref.load %arg13[%c0_30, %c0_31] : memref<1x1xf32, #tpu.memory_space<smem>>
    %42 = vector.broadcast %41 : f32 to vector<32x1xf32>
    %43 = arith.addf %40, %42 : vector<32x1xf32>
    %c0_32 = arith.constant 0 : index
    %c0_33 = arith.constant 0 : index
    %44 = vector.load %arg15[%c0_32, %c0_33] : memref<32x1xf32, #tpu.memory_space<vmem>>, vector<32x1xf32>
    tpu.vector_store %arg15[%c0_32, %c0_33], %43 {strides = array<i32>} : memref<32x1xf32, #tpu.memory_space<vmem>>, vector<32x1xf32>,
    %45 = vector.shape_cast %35 : vector<32x32xf32> to vector<4x8x32xf32>
    %c0_34 = arith.constant 0 : index
    %c0_35 = arith.constant 0 : index
    %46 = vector.load %arg12[%c0_34, %c0_35] : memref<8x32xf32, #tpu.memory_space<vmem>>, vector<8x32xf32>
    %47 = vector.shape_cast %46 : vector<8x32xf32> to vector<1x8x32xf32>
    %48 = vector.broadcast %47 : vector<1x8x32xf32> to vector<4x8x32xf32>
    %49 = arith.mulf %45, %48 : vector<4x8x32xf32>
    %cst_36 = arith.constant dense<0.000000e+00> : vector<4x32xf32>
    %50 = vector.multi_reduction <add>, %49, %cst_36 [1] : vector<4x8x32xf32> to vector<4x32xf32>
    %cst_37 = arith.constant dense<0.000000e+00> : vector<4xf32>
    %51 = vector.multi_reduction <add>, %50, %cst_37 [1] : vector<4x32xf32> to vector<4xf32>
    %52 = vector.shape_cast %51 : vector<4xf32> to vector<4x1xf32>
    %c0_38 = arith.constant 0 : index
    %c0_39 = arith.constant 0 : index
    %53 = memref.load %arg14[%c0_38, %c0_39] : memref<1x1xf32, #tpu.memory_space<smem>>
    %54 = vector.broadcast %53 : f32 to vector<4x1xf32>
    %55 = arith.addf %52, %54 : vector<4x1xf32>
    %56 = arith.negf %55 : vector<4x1xf32>
    %57 = math.exp %56 : vector<4x1xf32>
    %cst_40 = arith.constant 1.000000e+00 : f32
    %58 = vector.broadcast %cst_40 : f32 to vector<4x1xf32>
    %59 = arith.addf %58, %57 : vector<4x1xf32>
    %60 = arith.divf %58, %59 : vector<4x1xf32>
    %c0_41 = arith.constant 0 : index
    %c0_42 = arith.constant 0 : index
    %61 = vector.load %arg16[%c0_41, %c0_42] : memref<4x1xf32, #tpu.memory_space<vmem>>, vector<4x1xf32>
    tpu.vector_store %arg16[%c0_41, %c0_42], %60 {strides = array<i32>} : memref<4x1xf32, #tpu.memory_space<vmem>>, vector<4x1xf32>,
    return
  }
  func.func @transform_0(%arg0: i32) -> (i32, i32) {
    %c0_i32 = arith.constant 0 : i32
    %c0_i32_0 = arith.constant 0 : i32
    %c0_i32_1 = arith.constant 0 : i32
    return %c0_i32, %c0_i32_0 : i32, i32
  }
  func.func @transform_1(%arg0: i32) -> (i32, i32) {
    %c0_i32 = arith.constant 0 : i32
    %c0_i32_0 = arith.constant 0 : i32
    return %arg0, %c0_i32 : i32, i32
  }
  func.func @transform_2(%arg0: i32) -> (i32, i32) {
    %c0_i32 = arith.constant 0 : i32
    %c0_i32_0 = arith.constant 0 : i32
    %c0_i32_1 = arith.constant 0 : i32
    return %c0_i32, %c0_i32_0 : i32, i32
  }
  func.func @transform_3(%arg0: i32) -> (i32, i32) {
    %c0_i32 = arith.constant 0 : i32
    %c0_i32_0 = arith.constant 0 : i32
    %c0_i32_1 = arith.constant 0 : i32
    return %c0_i32, %c0_i32_0 : i32, i32
  }
  func.func @transform_4(%arg0: i32) -> (i32, i32) {
    %c0_i32 = arith.constant 0 : i32
    %c0_i32_0 = arith.constant 0 : i32
    %c0_i32_1 = arith.constant 0 : i32
    return %c0_i32, %c0_i32_0 : i32, i32
  }
  func.func @transform_5(%arg0: i32) -> (i32, i32) {
    %c0_i32 = arith.constant 0 : i32
    %c0_i32_0 = arith.constant 0 : i32
    %c0_i32_1 = arith.constant 0 : i32
    return %c0_i32, %c0_i32_0 : i32, i32
  }
  func.func @transform_6(%arg0: i32) -> (i32, i32) {
    %c0_i32 = arith.constant 0 : i32
    %c0_i32_0 = arith.constant 0 : i32
    %c0_i32_1 = arith.constant 0 : i32
    return %c0_i32, %c0_i32_0 : i32, i32
  }
  func.func @transform_7(%arg0: i32) -> (i32, i32) {
    %c0_i32 = arith.constant 0 : i32
    %c0_i32_0 = arith.constant 0 : i32
    %c0_i32_1 = arith.constant 0 : i32
    return %c0_i32, %c0_i32_0 : i32, i32
  }
  func.func @transform_8(%arg0: i32) -> (i32, i32) {
    %c0_i32 = arith.constant 0 : i32
    %c0_i32_0 = arith.constant 0 : i32
    %c0_i32_1 = arith.constant 0 : i32
    return %c0_i32, %c0_i32_0 : i32, i32
  }
  func.func @transform_9(%arg0: i32) -> (i32, i32) {
    %c0_i32 = arith.constant 0 : i32
    %c0_i32_0 = arith.constant 0 : i32
    %c0_i32_1 = arith.constant 0 : i32
    return %c0_i32, %c0_i32_0 : i32, i32
  }
  func.func @transform_10(%arg0: i32) -> (i32, i32) {
    %c0_i32 = arith.constant 0 : i32
    %c0_i32_0 = arith.constant 0 : i32
    %c0_i32_1 = arith.constant 0 : i32
    return %c0_i32, %c0_i32_0 : i32, i32
  }
  func.func @transform_11(%arg0: i32) -> (i32, i32) {
    %c0_i32 = arith.constant 0 : i32
    %c0_i32_0 = arith.constant 0 : i32
    %c0_i32_1 = arith.constant 0 : i32
    return %c0_i32, %c0_i32_0 : i32, i32
  }
  func.func @transform_12(%arg0: i32) -> (i32, i32) {
    %c0_i32 = arith.constant 0 : i32
    %c0_i32_0 = arith.constant 0 : i32
    %c0_i32_1 = arith.constant 0 : i32
    return %c0_i32, %c0_i32_0 : i32, i32
  }
  func.func @transform_13(%arg0: i32) -> (i32, i32) {
    %c0_i32 = arith.constant 0 : i32
    %c0_i32_0 = arith.constant 0 : i32
    %c0_i32_1 = arith.constant 0 : i32
    return %c0_i32, %c0_i32_0 : i32, i32
  }
  func.func @transform_14(%arg0: i32) -> (i32, i32) {
    %c0_i32 = arith.constant 0 : i32
    %c0_i32_0 = arith.constant 0 : i32
    return %arg0, %c0_i32 : i32, i32
  }
  func.func @transform_15(%arg0: i32) -> (i32, i32) {
    %c0_i32 = arith.constant 0 : i32
    %c0_i32_0 = arith.constant 0 : i32
    return %arg0, %c0_i32 : i32, i32
  }
}

</mosaic_0001>

<bundles_post_ra>
// kernel: tpu_custom_call.1
= control target key start
LH: loop header
LB: loop body
LE: loop exit
PB: predicated region body
PF: predicated region fallthrough
CT: control target
= control target key end

     0   :  { %23 = vsyncpa [#allocation5], 0  ;;  %s2646_s18 = smov [#allocation4]   ;;  %s3038_s0 = inlined_call_operand.vmem [shape: bf16[32,32], index: 0, kind: input, shape index: {}]   ;;  %s3039_s1 = inlined_call_operand.vmem [shape: f32[32,64], index: 1, kind: input, shape index: {}]   ;;  %s3040_s2 = inlined_call_operand.vmem [shape: bf16[64,512], index: 2, kind: input, shape index: {}]   ;;  %s3041_s3 = inlined_call_operand.vmem [shape: f32[1,512], index: 3, kind: input, shape index: {}]   ;;  %s3042_s4 = inlined_call_operand.hbm [shape: bf16[512,512], index: 4, kind: input, shape index: {}]   ;;  %s3043_s5 = inlined_call_operand.vmem [shape: f32[1,512], index: 5, kind: input, shape index: {}]   ;;  %s3044_s6 = inlined_call_operand.vmem [shape: bf16[512,32], index: 6, kind: input, shape index: {}]   ;;  %s3045_s7 = inlined_call_operand.vmem [shape: f32[1,32], index: 7, kind: input, shape index: {}]   ;;  %s3046_s8 = inlined_call_operand.vmem [shape: bf16[32,32], index: 8, kind: input, shape index: {}]   ;;  %s3047_s9 = inlined_call_operand.vmem [shape: f32[1,32], index: 9, kind: input, shape index: {}]   ;;  %s3048_s10 = inlined_call_operand.vmem [shape: f32[1,32], index: 10, kind: input, shape index: {}]   ;;  %s3049_s11 = inlined_call_operand.vmem [shape: f32[8,32], index: 11, kind: input, shape index: {}]   ;;  %s3050_s12 = inlined_call_operand.<no memory space> [shape: f32[1,1], index: 12, kind: input, shape index: {}]   ;;  %s3051_s13 = inlined_call_operand.<no memory space> [shape: f32[1,1], index: 13, kind: input, shape index: {}]   ;;  %s3052_s14 = inlined_call_operand.vmem [shape: f32[32,1], index: 14, kind: output, shape index: {0}]   ;;  %s3053_s15 = inlined_call_operand.vmem [shape: f32[4,1], index: 15, kind: output, shape index: {1}]  }
   0x1   :  { %s37_s19 = sshll.u32 %s2646_s18, 4  ;;  %s38_s19 = int_to_ptr.vmem [resolvable:$true] %s37_s19 }
   0x2   :  { %s2632_s20 = scalar_lea.vmem %s38_s19, 16384  ;;  %p2637_p1 = scmp.lt.s32.totalorder %s38_s19, %s38_s19 }
   0x3   :  { %p2633_p0 = scmp.ne.s32.totalorder %s38_s19, %s2632_s20  ;;  %p2638_p2 = scmp.lt.s32.totalorder %s2632_s20, %s2632_s20 }
   0x5   :  { %p2639_p3 = por %p2638_p2, %p2637_p1 }
   0x7   :  { %p2640_p4 = pnand %p2639_p3, %p2633_p0 }
   0x9   :  { %2643 = shalt.err (!%p2640_p4)
}
   0xa   :  { %s2647_s21 = smov 256   ;;  %s2648_s22 = smov 16  }
   0xb   :  { %43 = dma.hbm_to_vmem [thread:$0]  %s3042_s4, 16384, %s38_s19, [#allocation5], %s2647_s21, %s2647_s21, %s2648_s22  }
   0xc   :  { %2644 = dma.done.wait [#allocation5], 16384  }
   0xd   :  { %2645 = vsyncadd [#allocation5], 4294950912  ;;  %v72_v0 = vld [vmem:[%s3039_s1 + $0x10] sm:$0xff]  ;;  %v73_v1 = vld [vmem:[%s3039_s1 + $0x18] sm:$0xff]  ;;  %vm86_vm0 = vcmask 261120   ;;  %v2649_v24 = vmov 0  }
   0xe   :  { %v70_v2 = vld [vmem:[%s3039_s1] sm:$0xff]  ;;  %v75_v3 = vpack.c.bf16 %v73_v1, %v72_v0  ;;  %v71_v4 = vld [vmem:[%s3039_s1 + $0x8] sm:$0xff]  ;;  %301 = vmatprep.mubr.bf16.mxu1 %v2649_v24  ;;  %vm262_vm1 = vcmask 523264   ;;  %vm2055_vm2 = vcmask 1041409   ;;  %vm2057_vm3 = vcmask 1042434  }
   0xf   :  { %v74_v5 = vpack.c.bf16 %v71_v4, %v70_v2  ;;  %v2366_v6 = vld [vmem:[%s3038_s0] sm:$0xff]   ;;  %v2367_v8 = vld [vmem:[%s3038_s0 + $0x8] sm:$0xff]   ;;  %vm2059_vm4 = vcmask 1043459   ;;  %vm2062_vm5 = vcmask 257024   ;;  %vm2013_vm6 = vcmask 7168  }
  0x10   :  { %2346 = vmatprep.subr.bf16.mxu0 %v75_v3  ;;  %2350 = vmatprep.mubr.msk.bf16.mxu0 %vm86_vm0, %v2366_v6  ;;  %v2368_v7 = vld [vmem:[%s3040_s2 + $0x64] ss:$16 sps:$4 sm:$0xff]   ;;  %v2372_v9 = vld [vmem:[%s3040_s2 + $0x6c] ss:$16 sps:$4 sm:$0xff]   ;;  %v2373_v10 = vld [vmem:[%s3040_s2 + $0x60] ss:$16 sps:$4 sm:$0xff]  }
  0x11   :  { %2347 = vmatpush3.bf16.msra.mxu0 %v75_v3  ;;  %277 = vmatprep.subr.bf16.mxu1 %v2368_v7  ;;  %v2374_v11 = vld [vmem:[%s3040_s2 + $0x44] ss:$16 sps:$4 sm:$0xff]   ;;  %v2370_v12 = vld [vmem:[%s3040_s2 + $0x68] ss:$16 sps:$4 sm:$0xff]   ;;  %v2378_v13 = vld [vmem:[%s3040_s2 + $0x4c] ss:$16 sps:$4 sm:$0xff]  }
  0x12   :  { %2348 = vmatprep.subr.bf16.mxu0 %v74_v5  ;;  %278 = vmatpush1.bf16.msra.mxu1 %v2373_v10  ;;  %v2379_v14 = vld [vmem:[%s3040_s2 + $0x40] ss:$16 sps:$4 sm:$0xff]   ;;  %v2376_v15 = vld [vmem:[%s3040_s2 + $0x48] ss:$16 sps:$4 sm:$0xff]   ;;  %v2380_v16 = vld [vmem:[%s3040_s2 + $0x24] ss:$16 sps:$4 sm:$0xff]  }
  0x13   :  { %279 = vmatprep.subr.bf16.mxu1 %v2374_v11  ;;  %v2384_v17 = vld [vmem:[%s3040_s2 + $0x2c] ss:$16 sps:$4 sm:$0xff]   ;;  %v2382_v18 = vld [vmem:[%s3040_s2 + $0x28] ss:$16 sps:$4 sm:$0xff]   ;;  %v2385_v19 = vld [vmem:[%s3040_s2 + $0x20] ss:$16 sps:$4 sm:$0xff]  }
  0x14   :  { %v2386_v20 = vld [vmem:[%s3040_s2 + $0x4] ss:$16 sps:$4 sm:$0xff]   ;;  %v2390_v21 = vld [vmem:[%s3040_s2 + $0xc] ss:$16 sps:$4 sm:$0xff]   ;;  %v2388_v22 = vld [vmem:[%s3040_s2 + $0x8] ss:$16 sps:$4 sm:$0xff]  }
  0x15   :  { %2349 = vmatpush3.bf16.msra.mxu0 %v74_v5  ;;  %v2391_v23 = vld [vmem:[%s3040_s2] ss:$16 sps:$4 sm:$0xff]   ;;  %v2394_v25 = vld [vmem:[#allocation4 + $0xe4] ss:$16 sps:$4 sm:$0xff]   ;;  %vm2075_vm7 = vcmask 3072  }
  0x16   :  { %330 = vmatprep.subr.bf16.mxu0 %v2372_v9  ;;  %280 = vmatpush1.bf16.msra.mxu1 %v2379_v14  ;;  %v2397_v26 = vld [vmem:[#allocation4 + $0x2e4] ss:$16 sps:$4 sm:$0xff]   ;;  %v2392_v32 = vld [vmem:[#allocation4 + $0xe0] ss:$16 sps:$4 sm:$0xff]  }
  0x17   :  { %281 = vmatprep.subr.bf16.mxu1 %v2380_v16  ;;  %v2395_v33 = vld [vmem:[#allocation4 + $0x2e0] ss:$16 sps:$4 sm:$0xff]   ;;  %v2400_v34 = vld [vmem:[#allocation4 + $0xc4] ss:$16 sps:$4 sm:$0xff]  }
  0x18   :  { %2351 = vmatmul.mubr.msk.bf16.vlgmr.msra.gmra.mxu0 %vm86_vm0, %v2367_v8  ;;  %v2403_v35 = vld [vmem:[#allocation4 + $0x2c4] ss:$16 sps:$4 sm:$0xff]   ;;  %v2398_v36 = vld [vmem:[#allocation4 + $0xc0] ss:$16 sps:$4 sm:$0xff]  }
  0x19   :  { %331 = vmatpush1.bf16.msra.mxu0 %v2370_v12  ;;  %354 = vmatprep.mubr.bf16.mxu0 %v2649_v24  ;;  %v2401_v37 = vld [vmem:[#allocation4 + $0x2c0] ss:$16 sps:$4 sm:$0xff]   ;;  %v2406_v38 = vld [vmem:[#allocation4 + $0xa4] ss:$16 sps:$4 sm:$0xff]  }
  0x1a   :  { %332 = vmatprep.subr.bf16.mxu0 %v2378_v13  ;;  %282 = vmatpush1.bf16.msra.mxu1 %v2385_v19  ;;  %v2409_v39 = vld [vmem:[#allocation4 + $0x2a4] ss:$16 sps:$4 sm:$0xff]   ;;  %v2404_v41 = vld [vmem:[#allocation4 + $0xa0] ss:$16 sps:$4 sm:$0xff]  }
  0x1b   :  { %283 = vmatprep.subr.bf16.mxu1 %v2386_v20  ;;  %v2407_v42 = vld [vmem:[#allocation4 + $0x2a0] ss:$16 sps:$4 sm:$0xff]   ;;  %v2412_v43 = vld [vmem:[#allocation4 + $0x84] ss:$16 sps:$4 sm:$0xff]  }
  0x1c   :  { %v2415_v44 = vld [vmem:[#allocation4 + $0x284] ss:$16 sps:$4 sm:$0xff]   ;;  %v2410_v45 = vld [vmem:[#allocation4 + $0x80] ss:$16 sps:$4 sm:$0xff]  }
  0x1d   :  { %333 = vmatpush1.bf16.msra.mxu0 %v2376_v15  ;;  %v2413_v46 = vld [vmem:[#allocation4 + $0x280] ss:$16 sps:$4 sm:$0xff]   ;;  %v2418_v47 = vld [vmem:[#allocation4 + $0x64] ss:$16 sps:$4 sm:$0xff]  }
  0x1e   :  { %334 = vmatprep.subr.bf16.mxu0 %v2384_v17  ;;  %284 = vmatpush1.bf16.msra.mxu1 %v2391_v23  ;;  %v2421_v48 = vld [vmem:[#allocation4 + $0x264] ss:$16 sps:$4 sm:$0xff]   ;;  %v2416_v49 = vld [vmem:[#allocation4 + $0x60] ss:$16 sps:$4 sm:$0xff]  }
  0x1f   :  { %1189 = vmatprep.subr.bf16.mxu1 %v2394_v25  ;;  %v2419_v50 = vld [vmem:[#allocation4 + $0x260] ss:$16 sps:$4 sm:$0xff]   ;;  %v2424_v51 = vld [vmem:[#allocation4 + $0x44] ss:$16 sps:$4 sm:$0xff]  }
  0x20   :  { %v2427_v52 = vld [vmem:[#allocation4 + $0x244] ss:$16 sps:$4 sm:$0xff]   ;;  %v2422_v53 = vld [vmem:[#allocation4 + $0x40] ss:$16 sps:$4 sm:$0xff]  }
  0x21   :  { %335 = vmatpush1.bf16.msra.mxu0 %v2382_v18  ;;  %v2425_v54 = vld [vmem:[#allocation4 + $0x240] ss:$16 sps:$4 sm:$0xff]   ;;  %v2430_v55 = vld [vmem:[#allocation4 + $0x24] ss:$16 sps:$4 sm:$0xff]  }
  0x22   :  { %336 = vmatprep.subr.bf16.mxu0 %v2390_v21  ;;  %v2433_v56 = vld [vmem:[#allocation4 + $0x224] ss:$16 sps:$4 sm:$0xff]   ;;  %v2428_v57 = vld [vmem:[#allocation4 + $0x20] ss:$16 sps:$4 sm:$0xff]  }
  0x23   :  { %v2431_v58 = vld [vmem:[#allocation4 + $0x220] ss:$16 sps:$4 sm:$0xff]   ;;  %v2436_v59 = vld [vmem:[#allocation4 + $0x4] ss:$16 sps:$4 sm:$0xff]  }
  0x24   :  { %v2439_v60 = vld [vmem:[#allocation4 + $0x204] ss:$16 sps:$4 sm:$0xff]   ;;  %v2434_v61 = vld [vmem:[#allocation4] ss:$16 sps:$4 sm:$0xff]  }
  0x25   :  { %337 = vmatpush1.bf16.msra.mxu0 %v2388_v22  ;;  %v2437_v62 = vld [vmem:[#allocation4 + $0x200] ss:$16 sps:$4 sm:$0xff]   ;;  %v2442_v63 = vld [vmem:[#allocation4 + $0x1e4] ss:$16 sps:$4 sm:$0xff]  }
  0x26   :  { %1242 = vmatprep.subr.bf16.mxu0 %v2397_v26  ;;  %v2445_v0 = vld [vmem:[#allocation4 + $0x3e4] ss:$16 sps:$4 sm:$0xff]   ;;  %v2440_v1 = vld [vmem:[#allocation4 + $0x1e0] ss:$16 sps:$4 sm:$0xff]  }
  0x27   :  { %v2443_v2 = vld [vmem:[#allocation4 + $0x3e0] ss:$16 sps:$4 sm:$0xff]   ;;  %v2448_v3 = vld [vmem:[#allocation4 + $0x1c4] ss:$16 sps:$4 sm:$0xff]  }
  0x28   :  { %v2451_v4 = vld [vmem:[#allocation4 + $0x3c4] ss:$16 sps:$4 sm:$0xff]   ;;  %v2446_v5 = vld [vmem:[#allocation4 + $0x1c0] ss:$16 sps:$4 sm:$0xff]  }
  0x29   :  { %v2449_v6 = vld [vmem:[#allocation4 + $0x3c0] ss:$16 sps:$4 sm:$0xff]   ;;  %v2454_v7 = vld [vmem:[#allocation4 + $0x1a4] ss:$16 sps:$4 sm:$0xff]  }
  0x2a   :  { %v2457_v8 = vld [vmem:[#allocation4 + $0x3a4] ss:$16 sps:$4 sm:$0xff]   ;;  %v2452_v9 = vld [vmem:[#allocation4 + $0x1a0] ss:$16 sps:$4 sm:$0xff]  }
  0x2b   :  { %v2455_v10 = vld [vmem:[#allocation4 + $0x3a0] ss:$16 sps:$4 sm:$0xff]   ;;  %v2460_v11 = vld [vmem:[#allocation4 + $0x184] ss:$16 sps:$4 sm:$0xff]  }
  0x2c   :  { %v2463_v12 = vld [vmem:[#allocation4 + $0x384] ss:$16 sps:$4 sm:$0xff]   ;;  %v2458_v13 = vld [vmem:[#allocation4 + $0x180] ss:$16 sps:$4 sm:$0xff]  }
  0x2d   :  { %v2461_v14 = vld [vmem:[#allocation4 + $0x380] ss:$16 sps:$4 sm:$0xff]   ;;  %v2466_v15 = vld [vmem:[#allocation4 + $0x164] ss:$16 sps:$4 sm:$0xff]  }
  0x2e   :  { %v2469_v16 = vld [vmem:[#allocation4 + $0x364] ss:$16 sps:$4 sm:$0xff]   ;;  %v2464_v17 = vld [vmem:[#allocation4 + $0x160] ss:$16 sps:$4 sm:$0xff]  }
  0x2f   :  { %v2467_v18 = vld [vmem:[#allocation4 + $0x360] ss:$16 sps:$4 sm:$0xff]   ;;  %v2472_v19 = vld [vmem:[#allocation4 + $0x144] ss:$16 sps:$4 sm:$0xff]  }
  0x30   :  { %v2475_v20 = vld [vmem:[#allocation4 + $0x344] ss:$16 sps:$4 sm:$0xff]   ;;  %v2470_v21 = vld [vmem:[#allocation4 + $0x140] ss:$16 sps:$4 sm:$0xff]  }
  0x31   :  { %v2473_v22 = vld [vmem:[#allocation4 + $0x340] ss:$16 sps:$4 sm:$0xff]   ;;  %v2478_v23 = vld [vmem:[#allocation4 + $0x124] ss:$16 sps:$4 sm:$0xff]  }
  0x32   :  { %v2481_v25 = vld [vmem:[#allocation4 + $0x324] ss:$16 sps:$4 sm:$0xff]   ;;  %v2476_v26 = vld [vmem:[#allocation4 + $0x120] ss:$16 sps:$4 sm:$0xff]  }
  0xd8   :  { %v2352_v27 = vpop.f32.mrf.mxu0 }
  0xda   :  { %v127_v28 = vpop.f32.mrf.mxu0 }
  0xdc   :  { %v2353_v29 = vpop.f32.mrf.mxu0 }
  0xdd   :  { %v143_v40 = vpack.c.bf16 %v2353_v29, %v2352_v27  ;;  %v2479_v27 = vld [vmem:[#allocation4 + $0x320] ss:$16 sps:$4 sm:$0xff]   ;;  %v2487_v29 = vld [vmem:[#allocation4 + $0x304] ss:$16 sps:$4 sm:$0xff]  }
  0xde   :  { %v130_v30 = vpop.f32.mrf.mxu0 }
  0xdf   :  { %v142_v31 = vpack.c.bf16 %v130_v30, %v127_v28  ;;  %v2484_v28 = vld [vmem:[#allocation4 + $0x104] ss:$16 sps:$4 sm:$0xff]   ;;  %v2482_v30 = vld [vmem:[#allocation4 + $0x100] ss:$16 sps:$4 sm:$0xff]  }
  0xe1   :  { %2106 = vmatmul.mubr.msk.bf16.vlgmr.msra.gmra.mxu1 %vm262_vm1, %v142_v31  ;;  %2108 = vmatmul.mubr.msk.bf16.vlgmr.msra.gmra.mxu0 %vm262_vm1, %v142_v31  ;;  %v2485_v31 = vld [vmem:[#allocation4 + $0x300] ss:$16 sps:$4 sm:$0xff]  }
  0xe2   :  { %311 = vmatprep.mubr.bf16.mxu1 %v2649_v24  ;;  %364 = vmatprep.mubr.bf16.mxu0 %v2649_v24 }
  0xe3   :  { %1190 = vmatpush1.bf16.msra.mxu1 %v2392_v32  ;;  %1243 = vmatpush1.bf16.msra.mxu0 %v2395_v33  ;;  %v2490_v32 = vld [vmem:[#allocation4 + $0xec] ss:$16 sps:$4 sm:$0xff]  }
  0xe4   :  { %1191 = vmatprep.subr.bf16.mxu1 %v2400_v34  ;;  %1244 = vmatprep.subr.bf16.mxu0 %v2403_v35  ;;  %v2493_v33 = vld [vmem:[#allocation4 + $0x2ec] ss:$16 sps:$4 sm:$0xff]   ;;  %v162_v34 = vlaneseq }
  0xe6   :  { %v2809_v35 = vshrl.u32 %v162_v34, 7  ;;  %v2502_v34 = vld [vmem:[#allocation4 + $0xac] ss:$16 sps:$4 sm:$0xff]  }
  0xe7   :  { %1192 = vmatpush1.bf16.msra.mxu1 %v2398_v36  ;;  %1245 = vmatpush1.bf16.msra.mxu0 %v2401_v37 }
  0xe8   :  { %1193 = vmatprep.subr.bf16.mxu1 %v2406_v38  ;;  %1246 = vmatprep.subr.bf16.mxu0 %v2409_v39  ;;  %v168_v36 = vsub.s32 1, %v2809_v35  ;;  %v176_v37 = vsub.s32 3, %v2809_v35  ;;  %v164_v38 = vsub.s32 0, %v2809_v35  ;;  %v172_v39 = vsub.s32 2, %v2809_v35 }
  0xe9   :  { %2107 = vmatmul.mubr.msk.bf16.gmra.mxu1 %vm262_vm1, %v143_v40  ;;  %2109 = vmatmul.mubr.msk.bf16.gmra.mxu0 %vm262_vm1, %v143_v40  ;;  %v160_v40 = vld [vmem:[%s3041_s3] sm:$0xf] }
  0xeb   :  { %1194 = vmatpush1.bf16.msra.mxu1 %v2404_v41  ;;  %1247 = vmatpush1.bf16.msra.mxu0 %v2407_v42 }
  0xec   :  { %1195 = vmatprep.subr.bf16.mxu1 %v2412_v43  ;;  %1248 = vmatprep.subr.bf16.mxu0 %v2415_v44  ;;  %v169_v43 = vrot.slane %v160_v40, %v168_v36  ;;  %v177_v44 = vrot.slane %v160_v40, %v176_v37 }
  0xef   :  { %1196 = vmatpush1.bf16.msra.mxu1 %v2410_v45  ;;  %1249 = vmatpush1.bf16.msra.mxu0 %v2413_v46  ;;  %v165_v45 = vrot.slane %v160_v40, %v164_v38  ;;  %v173_v46 = vrot.slane %v160_v40, %v172_v39  ;;  %v2505_v40 = vld [vmem:[#allocation4 + $0x2ac] ss:$16 sps:$4 sm:$0xff]  }
  0xf0   :  { %1197 = vmatprep.subr.bf16.mxu1 %v2418_v47  ;;  %1250 = vmatprep.subr.bf16.mxu0 %v2421_v48 }
  0xf3   :  { %1198 = vmatpush1.bf16.msra.mxu1 %v2416_v49  ;;  %1251 = vmatpush1.bf16.msra.mxu0 %v2419_v50 }
  0xf4   :  { %1199 = vmatprep.subr.bf16.mxu1 %v2424_v51  ;;  %1252 = vmatprep.subr.bf16.mxu0 %v2427_v52 }
  0xf7   :  { %1200 = vmatpush1.bf16.msra.mxu1 %v2422_v53  ;;  %1253 = vmatpush1.bf16.msra.mxu0 %v2425_v54 }
  0xf8   :  { %1201 = vmatprep.subr.bf16.mxu1 %v2430_v55  ;;  %1254 = vmatprep.subr.bf16.mxu0 %v2433_v56 }
  0xfb   :  { %1202 = vmatpush1.bf16.msra.mxu1 %v2428_v57  ;;  %1255 = vmatpush1.bf16.msra.mxu0 %v2431_v58 }
  0xfc   :  { %1203 = vmatprep.subr.bf16.mxu1 %v2436_v59  ;;  %1256 = vmatprep.subr.bf16.mxu0 %v2439_v60 }
  0xff   :  { %1204 = vmatpush1.bf16.msra.mxu1 %v2434_v61  ;;  %1257 = vmatpush1.bf16.msra.mxu0 %v2437_v62 }
 0x100   :  { %1205 = vmatprep.subr.bf16.mxu1 %v2442_v63  ;;  %1258 = vmatprep.subr.bf16.mxu0 %v2445_v0 }
 0x103   :  { %1206 = vmatpush2.bf16.msra.mxu1 %v2440_v1  ;;  %1259 = vmatpush2.bf16.msra.mxu0 %v2443_v2 }
 0x104   :  { %1207 = vmatprep.subr.bf16.mxu1 %v2448_v3  ;;  %1260 = vmatprep.subr.bf16.mxu0 %v2451_v4 }
 0x107   :  { %1208 = vmatpush2.bf16.msra.mxu1 %v2446_v5  ;;  %1261 = vmatpush2.bf16.msra.mxu0 %v2449_v6 }
 0x108   :  { %1209 = vmatprep.subr.bf16.mxu1 %v2454_v7  ;;  %1262 = vmatprep.subr.bf16.mxu0 %v2457_v8 }
 0x10b   :  { %1210 = vmatpush2.bf16.msra.mxu1 %v2452_v9  ;;  %1263 = vmatpush2.bf16.msra.mxu0 %v2455_v10 }
 0x10c   :  { %1211 = vmatprep.subr.bf16.mxu1 %v2460_v11  ;;  %1264 = vmatprep.subr.bf16.mxu0 %v2463_v12  ;;  %v2488_v11 = vld [vmem:[#allocation4 + $0xe8] ss:$16 sps:$4 sm:$0xff]  }
 0x10d   :  { %v2491_v12 = vld [vmem:[#allocation4 + $0x2e8] ss:$16 sps:$4 sm:$0xff]  }
 0x10f   :  { %1212 = vmatpush2.bf16.msra.mxu1 %v2458_v13  ;;  %1265 = vmatpush2.bf16.msra.mxu0 %v2461_v14 }
 0x110   :  { %1213 = vmatprep.subr.bf16.mxu1 %v2466_v15  ;;  %1266 = vmatprep.subr.bf16.mxu0 %v2469_v16 }
 0x113   :  { %1214 = vmatpush2.bf16.msra.mxu1 %v2464_v17  ;;  %1267 = vmatpush2.bf16.msra.mxu0 %v2467_v18  ;;  %v2496_v18 = vld [vmem:[#allocation4 + $0xcc] ss:$16 sps:$4 sm:$0xff]  }
 0x114   :  { %1215 = vmatprep.subr.bf16.mxu1 %v2472_v19  ;;  %1268 = vmatprep.subr.bf16.mxu0 %v2475_v20  ;;  %v2499_v19 = vld [vmem:[#allocation4 + $0x2cc] ss:$16 sps:$4 sm:$0xff]  }
 0x117   :  { %1216 = vmatpush2.bf16.msra.mxu1 %v2470_v21  ;;  %1269 = vmatpush2.bf16.msra.mxu0 %v2473_v22 }
 0x118   :  { %1217 = vmatprep.subr.bf16.mxu1 %v2478_v23  ;;  %1270 = vmatprep.subr.bf16.mxu0 %v2481_v25 }
 0x11b   :  { %1218 = vmatpush2.bf16.msra.mxu1 %v2476_v26  ;;  %1271 = vmatpush2.bf16.msra.mxu0 %v2479_v27 }
 0x11c   :  { %1219 = vmatprep.subr.bf16.mxu1 %v2484_v28  ;;  %1272 = vmatprep.subr.bf16.mxu0 %v2487_v29 }
 0x11f   :  { %1220 = vmatpush2.bf16.msra.mxu1 %v2482_v30  ;;  %1273 = vmatpush2.bf16.msra.mxu0 %v2485_v31  ;;  %v2494_v30 = vld [vmem:[#allocation4 + $0xc8] ss:$16 sps:$4 sm:$0xff]  }
 0x120   :  { %1295 = vmatprep.subr.bf16.mxu1 %v2490_v32  ;;  %1348 = vmatprep.subr.bf16.mxu0 %v2493_v33  ;;  %v2497_v31 = vld [vmem:[#allocation4 + $0x2c8] ss:$16 sps:$4 sm:$0xff]  }
 0x1a1   :  { %v303_v41 = vpop.f32.mrf.mxu1  ;;  %v356_v42 = vpop.f32.mrf.mxu0 }
 0x1a2   :  { %v304_v55 = vadd.f32 %v303_v41, %v165_v45  ;;  %v357_v56 = vadd.f32 %v356_v42, %v173_v46 }
 0x1a3   :  { %v305_v47 = vpop.f32.mrf.mxu1  ;;  %v358_v48 = vpop.f32.mrf.mxu0 }
 0x1a4   :  { %v306_v51 = vadd.f32 %v305_v47, %v169_v43  ;;  %v359_v52 = vadd.f32 %v358_v48, %v177_v44  ;;  %v375_v5 = vmax.f32 %v304_v55, 0.0  ;;  %v377_v6 = vmax.f32 %v357_v56, 0.0  ;;  %v2506_v55 = vld [vmem:[#allocation4 + $0x88] ss:$16 sps:$4 sm:$0xff]  }
 0x1a5   :  { %v307_v49 = vpop.f32.mrf.mxu1  ;;  %v360_v50 = vpop.f32.mrf.mxu0  ;;  %v2509_v56 = vld [vmem:[#allocation4 + $0x288] ss:$16 sps:$4 sm:$0xff]  }
 0x1a6   :  { %v308_v53 = vadd.f32 %v307_v49, %v165_v45  ;;  %v361_v54 = vadd.f32 %v360_v50, %v173_v46  ;;  %v376_v1 = vmax.f32 %v306_v51, 0.0  ;;  %v378_v2 = vmax.f32 %v359_v52, 0.0  ;;  %v2503_v50 = vld [vmem:[#allocation4 + $0x2a8] ss:$16 sps:$4 sm:$0xff]  }
 0x1a7   :  { %v309_v57 = vpop.f32.mrf.mxu1  ;;  %v362_v58 = vpop.f32.mrf.mxu0 }
 0x1a8   :  { %v310_v59 = vadd.f32 %v309_v57, %v169_v43  ;;  %v363_v60 = vadd.f32 %v362_v58, %v177_v44  ;;  %v379_v61 = vmax.f32 %v308_v53, 0.0  ;;  %v381_v62 = vmax.f32 %v361_v54, 0.0  ;;  %v2508_v53 = vld [vmem:[#allocation4 + $0x8c] ss:$16 sps:$4 sm:$0xff]  }
 0x1a9   :  { %v313_v63 = vpop.f32.mrf.mxu1  ;;  %v366_v0 = vpop.f32.mrf.mxu0  ;;  %v2511_v54 = vld [vmem:[#allocation4 + $0x28c] ss:$16 sps:$4 sm:$0xff]  }
 0x1aa   :  { %v380_v3 = vmax.f32 %v310_v59, 0.0  ;;  %v382_v4 = vmax.f32 %v363_v60, 0.0  ;;  %v2826_v13 = vpack.c.bf16 %v379_v61, %v375_v5  ;;  %v2828_v14 = vpack.c.bf16 %v381_v62, %v377_v6  ;;  %v2514_v57 = vld [vmem:[#allocation4 + $0x6c] ss:$16 sps:$4 sm:$0xff]   ;;  %v2512_v59 = vld [vmem:[#allocation4 + $0x68] ss:$16 sps:$4 sm:$0xff]  }
 0x1ab   :  { %v315_v7 = vpop.f32.mrf.mxu1  ;;  %v368_v8 = vpop.f32.mrf.mxu0  ;;  %v314_v23 = vadd.f32 %v313_v63, %v165_v45  ;;  %v367_v25 = vadd.f32 %v366_v0, %v173_v46  ;;  %v2517_v58 = vld [vmem:[#allocation4 + $0x26c] ss:$16 sps:$4 sm:$0xff]   ;;  %v2515_v60 = vld [vmem:[#allocation4 + $0x268] ss:$16 sps:$4 sm:$0xff]  }
 0x1ac   :  { %v392_v9 = vpack.c.bf16 %v380_v3, %v376_v1  ;;  %v394_v10 = vpack.c.bf16 %v382_v4, %v378_v2  ;;  %v316_v15 = vadd.f32 %v315_v7, %v169_v43  ;;  %v369_v20 = vadd.f32 %v368_v8, %v177_v44  ;;  %v2520_v61 = vld [vmem:[#allocation4 + $0x4c] ss:$16 sps:$4 sm:$0xff]   ;;  %v2518_v63 = vld [vmem:[#allocation4 + $0x48] ss:$16 sps:$4 sm:$0xff]  }
 0x1ad   :  { %v317_v16 = vpop.f32.mrf.mxu1  ;;  %v370_v17 = vpop.f32.mrf.mxu0  ;;  %v383_v47 = vmax.f32 %v314_v23, 0.0  ;;  %v385_v48 = vmax.f32 %v367_v25, 0.0  ;;  %v2523_v62 = vld [vmem:[#allocation4 + $0x24c] ss:$16 sps:$4 sm:$0xff]   ;;  %v2521_v0 = vld [vmem:[#allocation4 + $0x248] ss:$16 sps:$4 sm:$0xff]  }
 0x1ae   :  { %v318_v21 = vadd.f32 %v317_v16, %v165_v45  ;;  %v371_v22 = vadd.f32 %v370_v17, %v173_v46  ;;  %1221 = vmatprep.mubr.bf16.mxu1 %v392_v9  ;;  %1274 = vmatprep.mubr.bf16.mxu0 %v394_v10  ;;  %v384_v41 = vmax.f32 %v316_v15, 0.0  ;;  %v386_v42 = vmax.f32 %v369_v20, 0.0  ;;  %v2526_v1 = vld [vmem:[#allocation4 + $0x2c] ss:$16 sps:$4 sm:$0xff]   ;;  %v2524_v3 = vld [vmem:[#allocation4 + $0x28] ss:$16 sps:$4 sm:$0xff]  }
 0x1af   :  { %v319_v26 = vpop.f32.mrf.mxu1  ;;  %v372_v27 = vpop.f32.mrf.mxu0  ;;  %1222 = vmatmul.mubr.bf16.vlgmr.msra.gmra.mxu1 %v2826_v13  ;;  %1275 = vmatmul.mubr.bf16.vlgmr.msra.gmra.mxu0 %v2828_v14  ;;  %v2529_v2 = vld [vmem:[#allocation4 + $0x22c] ss:$16 sps:$4 sm:$0xff]   ;;  %v2527_v4 = vld [vmem:[#allocation4 + $0x228] ss:$16 sps:$4 sm:$0xff]  }
 0x1b0   :  { %v320_v28 = vadd.f32 %v319_v26, %v169_v43  ;;  %v373_v29 = vadd.f32 %v372_v27, %v177_v44  ;;  %1296 = vmatpush1.bf16.msra.mxu1 %v2488_v11  ;;  %1349 = vmatpush1.bf16.msra.mxu0 %v2491_v12  ;;  %v387_v32 = vmax.f32 %v318_v21, 0.0  ;;  %v389_v33 = vmax.f32 %v371_v22, 0.0  ;;  %v2500_v44 = vld [vmem:[#allocation4 + $0xa8] ss:$16 sps:$4 sm:$0xff]   ;;  %v2532_v5 = vld [vmem:[#allocation4 + $0xc] ss:$16 sps:$4 sm:$0xff]  }
 0x1b1   :  { %1297 = vmatprep.subr.bf16.mxu1 %v2496_v18  ;;  %1350 = vmatprep.subr.bf16.mxu0 %v2499_v19  ;;  %v2535_v6 = vld [vmem:[#allocation4 + $0x20c] ss:$16 sps:$4 sm:$0xff]   ;;  %v2530_v7 = vld [vmem:[#allocation4 + $0x8] ss:$16 sps:$4 sm:$0xff]  }
 0x1b2   :  { %v388_v45 = vmax.f32 %v320_v28, 0.0  ;;  %v390_v46 = vmax.f32 %v373_v29, 0.0  ;;  %v2836_v51 = vpack.c.bf16 %v387_v32, %v383_v47  ;;  %v2838_v52 = vpack.c.bf16 %v389_v33, %v385_v48  ;;  %v2533_v8 = vld [vmem:[#allocation4 + $0x208] ss:$16 sps:$4 sm:$0xff]   ;;  %v2544_v15 = vld [vmem:[#allocation4 + $0x1cc] ss:$16 sps:$4 sm:$0xff]  }
 0x1b3   :  { %v2536_v11 = vld [vmem:[#allocation4 + $0x1e8] ss:$16 sps:$4 sm:$0xff]   ;;  %v2547_v16 = vld [vmem:[#allocation4 + $0x3cc] ss:$16 sps:$4 sm:$0xff]  }
 0x1b4   :  { %v2832_v49 = vpack.c.bf16 %v388_v45, %v384_v41  ;;  %v2834_v43 = vpack.c.bf16 %v390_v46, %v386_v42  ;;  %1298 = vmatpush1.bf16.msra.mxu1 %v2494_v30  ;;  %1351 = vmatpush1.bf16.msra.mxu0 %v2497_v31  ;;  %v2539_v12 = vld [vmem:[#allocation4 + $0x3e8] ss:$16 sps:$4 sm:$0xff]   ;;  %v2550_v19 = vld [vmem:[#allocation4 + $0x1ac] ss:$16 sps:$4 sm:$0xff]  }
 0x1b5   :  { %1299 = vmatprep.subr.bf16.mxu1 %v2502_v34  ;;  %1352 = vmatprep.subr.bf16.mxu0 %v2505_v40  ;;  %v2542_v17 = vld [vmem:[#allocation4 + $0x1c8] ss:$16 sps:$4 sm:$0xff]   ;;  %v2553_v20 = vld [vmem:[#allocation4 + $0x3ac] ss:$16 sps:$4 sm:$0xff]  }
 0x1b6   :  { %1231 = vmatprep.mubr.bf16.mxu1 %v2832_v49  ;;  %1284 = vmatprep.mubr.bf16.mxu0 %v2834_v43  ;;  %v2545_v18 = vld [vmem:[#allocation4 + $0x3c8] ss:$16 sps:$4 sm:$0xff]   ;;  %v2556_v23 = vld [vmem:[#allocation4 + $0x18c] ss:$16 sps:$4 sm:$0xff]  }
 0x1b7   :  { %1232 = vmatmul.mubr.bf16.gmra.mxu1 %v2836_v51  ;;  %1285 = vmatmul.mubr.bf16.gmra.mxu0 %v2838_v52  ;;  %v2548_v21 = vld [vmem:[#allocation4 + $0x1a8] ss:$16 sps:$4 sm:$0xff]   ;;  %v2559_v25 = vld [vmem:[#allocation4 + $0x38c] ss:$16 sps:$4 sm:$0xff]  }
 0x1b8   :  { %1300 = vmatpush1.bf16.msra.mxu1 %v2500_v44  ;;  %1353 = vmatpush1.bf16.msra.mxu0 %v2503_v50  ;;  %v2551_v22 = vld [vmem:[#allocation4 + $0x3a8] ss:$16 sps:$4 sm:$0xff]   ;;  %v2562_v28 = vld [vmem:[#allocation4 + $0x16c] ss:$16 sps:$4 sm:$0xff]  }
 0x1b9   :  { %1327 = vmatprep.mubr.bf16.mxu1 %v392_v9  ;;  %1380 = vmatprep.mubr.bf16.mxu0 %v394_v10  ;;  %v2538_v9 = vld [vmem:[#allocation4 + $0x1ec] ss:$16 sps:$4 sm:$0xff]   ;;  %v2554_v26 = vld [vmem:[#allocation4 + $0x188] ss:$16 sps:$4 sm:$0xff]  }
 0x1ba   :  { %1301 = vmatprep.subr.bf16.mxu1 %v2508_v53  ;;  %1354 = vmatprep.subr.bf16.mxu0 %v2511_v54  ;;  %v2541_v10 = vld [vmem:[#allocation4 + $0x3ec] ss:$16 sps:$4 sm:$0xff]   ;;  %v2557_v27 = vld [vmem:[#allocation4 + $0x388] ss:$16 sps:$4 sm:$0xff]  }
 0x1bb   :  { %v2565_v29 = vld [vmem:[#allocation4 + $0x36c] ss:$16 sps:$4 sm:$0xff]   ;;  %v2560_v30 = vld [vmem:[#allocation4 + $0x168] ss:$16 sps:$4 sm:$0xff]  }
 0x1bc   :  { %1302 = vmatpush1.bf16.msra.mxu1 %v2506_v55  ;;  %1355 = vmatpush1.bf16.msra.mxu0 %v2509_v56  ;;  %v2563_v31 = vld [vmem:[#allocation4 + $0x368] ss:$16 sps:$4 sm:$0xff]   ;;  %v2568_v32 = vld [vmem:[#allocation4 + $0x14c] ss:$16 sps:$4 sm:$0xff]  }
 0x1bd   :  { %1303 = vmatprep.subr.bf16.mxu1 %v2514_v57  ;;  %1356 = vmatprep.subr.bf16.mxu0 %v2517_v58  ;;  %v2571_v33 = vld [vmem:[#allocation4 + $0x34c] ss:$16 sps:$4 sm:$0xff]   ;;  %v2566_v34 = vld [vmem:[#allocation4 + $0x148] ss:$16 sps:$4 sm:$0xff]  }
 0x1be   :  { %v2569_v40 = vld [vmem:[#allocation4 + $0x348] ss:$16 sps:$4 sm:$0xff]   ;;  %v2574_v41 = vld [vmem:[#allocation4 + $0x12c] ss:$16 sps:$4 sm:$0xff]  }
 0x1bf   :  { %v2577_v42 = vld [vmem:[#allocation4 + $0x32c] ss:$16 sps:$4 sm:$0xff]   ;;  %v2572_v45 = vld [vmem:[#allocation4 + $0x128] ss:$16 sps:$4 sm:$0xff]  }
 0x1c0   :  { %1304 = vmatpush1.bf16.msra.mxu1 %v2512_v59  ;;  %1357 = vmatpush1.bf16.msra.mxu0 %v2515_v60  ;;  %v2575_v46 = vld [vmem:[#allocation4 + $0x328] ss:$16 sps:$4 sm:$0xff]   ;;  %v2580_v47 = vld [vmem:[#allocation4 + $0x10c] ss:$16 sps:$4 sm:$0xff]  }
 0x1c1   :  { %1305 = vmatprep.subr.bf16.mxu1 %v2520_v61  ;;  %1358 = vmatprep.subr.bf16.mxu0 %v2523_v62  ;;  %v2583_v48 = vld [vmem:[#allocation4 + $0x30c] ss:$16 sps:$4 sm:$0xff]   ;;  %v2578_v44 = vld [vmem:[#allocation4 + $0x108] ss:$16 sps:$4 sm:$0xff]  }
 0x1c2   :  { %v2581_v50 = vld [vmem:[#allocation4 + $0x308] ss:$16 sps:$4 sm:$0xff]  }
 0x1c4   :  { %1306 = vmatpush1.bf16.msra.mxu1 %v2518_v63  ;;  %1359 = vmatpush1.bf16.msra.mxu0 %v2521_v0 }
 0x1c5   :  { %1307 = vmatprep.subr.bf16.mxu1 %v2526_v1  ;;  %1360 = vmatprep.subr.bf16.mxu0 %v2529_v2 }
 0x1c8   :  { %1308 = vmatpush1.bf16.msra.mxu1 %v2524_v3  ;;  %1361 = vmatpush1.bf16.msra.mxu0 %v2527_v4 }
 0x1c9   :  { %1309 = vmatprep.subr.bf16.mxu1 %v2532_v5  ;;  %1362 = vmatprep.subr.bf16.mxu0 %v2535_v6 }
 0x1cc   :  { %1310 = vmatpush1.bf16.msra.mxu1 %v2530_v7  ;;  %1363 = vmatpush1.bf16.msra.mxu0 %v2533_v8 }
 0x1cd   :  { %1311 = vmatprep.subr.bf16.mxu1 %v2538_v9  ;;  %1364 = vmatprep.subr.bf16.mxu0 %v2541_v10 }
 0x1d0   :  { %1312 = vmatpush2.bf16.msra.mxu1 %v2536_v11  ;;  %1365 = vmatpush2.bf16.msra.mxu0 %v2539_v12 }
 0x1d1   :  { %1313 = vmatprep.subr.bf16.mxu1 %v2544_v15  ;;  %1366 = vmatprep.subr.bf16.mxu0 %v2547_v16 }
 0x1d4   :  { %1314 = vmatpush2.bf16.msra.mxu1 %v2542_v17  ;;  %1367 = vmatpush2.bf16.msra.mxu0 %v2545_v18 }
 0x1d5   :  { %1315 = vmatprep.subr.bf16.mxu1 %v2550_v19  ;;  %1368 = vmatprep.subr.bf16.mxu0 %v2553_v20 }
 0x1d8   :  { %1316 = vmatpush2.bf16.msra.mxu1 %v2548_v21  ;;  %1369 = vmatpush2.bf16.msra.mxu0 %v2551_v22 }
 0x1d9   :  { %1317 = vmatprep.subr.bf16.mxu1 %v2556_v23  ;;  %1370 = vmatprep.subr.bf16.mxu0 %v2559_v25 }
 0x1dc   :  { %1318 = vmatpush2.bf16.msra.mxu1 %v2554_v26  ;;  %1371 = vmatpush2.bf16.msra.mxu0 %v2557_v27 }
 0x1dd   :  { %1319 = vmatprep.subr.bf16.mxu1 %v2562_v28  ;;  %1372 = vmatprep.subr.bf16.mxu0 %v2565_v29 }
 0x1e0   :  { %1320 = vmatpush2.bf16.msra.mxu1 %v2560_v30  ;;  %1373 = vmatpush2.bf16.msra.mxu0 %v2563_v31  ;;  %v2584_v30 = vld [vmem:[%s3044_s6 + $0x78] sm:$0xff]  }
 0x1e1   :  { %1321 = vmatprep.subr.bf16.mxu1 %v2568_v32  ;;  %1374 = vmatprep.subr.bf16.mxu0 %v2571_v33  ;;  %v2585_v32 = vld [vmem:[%s3044_s6 + $0x38] sm:$0xff]   ;;  %v2586_v33 = vld [vmem:[%s3044_s6 + $0x70] sm:$0xff]  }
 0x1e4   :  { %1322 = vmatpush2.bf16.msra.mxu1 %v2566_v34  ;;  %1375 = vmatpush2.bf16.msra.mxu0 %v2569_v40  ;;  %v2875_v34 = vld [vmem:[%s3038_s0] sm:$0xff]   ;;  %v2587_v40 = vld [vmem:[%s3044_s6 + $0x30] sm:$0xff]  }
 0x1e5   :  { %1323 = vmatprep.subr.bf16.mxu1 %v2574_v41  ;;  %1376 = vmatprep.subr.bf16.mxu0 %v2577_v42  ;;  %v2590_v41 = vld [vmem:[%s3044_s6 + $0x68] sm:$0xff]  }
 0x1e6   :  { %v2591_v42 = vld [vmem:[%s3044_s6 + $0x28] sm:$0xff]  }
 0x1e8   :  { %1324 = vmatpush2.bf16.msra.mxu1 %v2572_v45  ;;  %1377 = vmatpush2.bf16.msra.mxu0 %v2575_v46  ;;  %v2594_v45 = vld [vmem:[%s3044_s6 + $0x60] sm:$0xff]   ;;  %v2895_v46 = vld [vmem:[%s3038_s0 + $0x8] sm:$0xff]  }
 0x1e9   :  { %1325 = vmatprep.subr.bf16.mxu1 %v2580_v47  ;;  %1378 = vmatprep.subr.bf16.mxu0 %v2583_v48  ;;  %v2595_v47 = vld [vmem:[%s3044_s6 + $0x20] sm:$0xff]   ;;  %v2598_v48 = vld [vmem:[%s3044_s6 + $0x58] sm:$0xff]  }
 0x1ec   :  { %1326 = vmatpush2.bf16.msra.mxu1 %v2578_v44  ;;  %1379 = vmatpush2.bf16.msra.mxu0 %v2581_v50  ;;  %v2599_v44 = vld [vmem:[%s3044_s6 + $0x18] sm:$0xff]   ;;  %v2602_v50 = vld [vmem:[%s3044_s6 + $0x50] sm:$0xff]  }
 0x1ef   :  { %1328 = vmatmul.mubr.bf16.vlgmr.msra.gmra.mxu1 %v2826_v13  ;;  %1381 = vmatmul.mubr.bf16.vlgmr.msra.gmra.mxu0 %v2828_v14 }
 0x1f0   :  { %1337 = vmatprep.mubr.bf16.mxu1 %v2832_v49  ;;  %1390 = vmatprep.mubr.bf16.mxu0 %v2834_v43  ;;  %v2855_v49 = vld [vmem:[%s3043_s5] sm:$0xf] }
 0x1f1   :  { %v532_v59 = vrot.slane %v2855_v49, %v164_v38 }
 0x1f7   :  { %1338 = vmatmul.mubr.bf16.gmra.mxu1 %v2836_v51  ;;  %1391 = vmatmul.mubr.bf16.gmra.mxu0 %v2838_v52  ;;  %v536_v52 = vrot.slane %v2855_v49, %v168_v36 }
 0x1f8   :  { %1457 = vmatprep.mubr.bf16.mxu1 %v2649_v24  ;;  %1510 = vmatprep.mubr.bf16.mxu0 %v2649_v24 }
 0x26f   :  { %v1223_v53 = vpop.f32.mrf.mxu1  ;;  %v1276_v54 = vpop.f32.mrf.mxu0 }
 0x270   :  { %v1224_v36 = vadd.f32 %v1223_v53, %v532_v59  ;;  %v2603_v53 = vld [vmem:[%s3044_s6 + $0x10] sm:$0xff]  }
 0x271   :  { %v1225_v55 = vpop.f32.mrf.mxu1  ;;  %v1278_v56 = vpop.f32.mrf.mxu0 }
 0x272   :  { %v1226_v3 = vadd.f32 %v1225_v55, %v536_v52  ;;  %v1277_v21 = vadd.f32 %v1276_v54, %v1224_v36 }
 0x273   :  { %v1227_v57 = vpop.f32.mrf.mxu1  ;;  %v1280_v13 = vpop.f32.mrf.mxu0 }
 0x274   :  { %v1228_v5 = vadd.f32 %v1227_v57, %v532_v59  ;;  %v1279_v15 = vadd.f32 %v1278_v56, %v1226_v3  ;;  %v1401_v29 = vmax.f32 %v1277_v21, 0.0 }
 0x275   :  { %v1229_v58 = vpop.f32.mrf.mxu1  ;;  %v1282_v14 = vpop.f32.mrf.mxu0 }
 0x276   :  { %v1230_v62 = vadd.f32 %v1229_v58, %v536_v52  ;;  %v1281_v16 = vadd.f32 %v1280_v13, %v1228_v5  ;;  %v1402_v23 = vmax.f32 %v1279_v15, 0.0 }
 0x277   :  { %v1233_v43 = vpop.f32.mrf.mxu1  ;;  %v1286_v51 = vpop.f32.mrf.mxu0 }
 0x278   :  { %v1234_v0 = vadd.f32 %v1233_v43, %v532_v59  ;;  %v1283_v7 = vadd.f32 %v1282_v14, %v1230_v62  ;;  %v1405_v26 = vmax.f32 %v1281_v16, 0.0 }
 0x279   :  { %v1235_v60 = vpop.f32.mrf.mxu1  ;;  %v1288_v61 = vpop.f32.mrf.mxu0 }
 0x27a   :  { %v1236_v63 = vadd.f32 %v1235_v60, %v536_v52  ;;  %v1287_v11 = vadd.f32 %v1286_v51, %v1234_v0  ;;  %v1406_v18 = vmax.f32 %v1283_v7, 0.0  ;;  %v1417_v31 = vpack.c.bf16 %v1405_v26, %v1401_v29  ;;  %v2589_v29 = vld [vmem:[%s3044_s6 + $0xb8] sm:$0xff]  }
 0x27b   :  { %v1237_v1 = vpop.f32.mrf.mxu1  ;;  %v1290_v2 = vpop.f32.mrf.mxu0  ;;  %v540_v60 = vrot.slane %v2855_v49, %v172_v39 }
 0x27c   :  { %v1238_v4 = vadd.f32 %v1237_v1, %v532_v59  ;;  %v1289_v8 = vadd.f32 %v1288_v61, %v1236_v63  ;;  %v1409_v22 = vmax.f32 %v1287_v11, 0.0  ;;  %v1418_v28 = vpack.c.bf16 %v1406_v18, %v1402_v23 }
 0x27d   :  { %v1239_v6 = vpop.f32.mrf.mxu1  ;;  %v1292_v12 = vpop.f32.mrf.mxu0  ;;  %v544_v59 = vrot.slane %v2855_v49, %v176_v37 }
 0x27e   :  { %v1291_v9 = vadd.f32 %v1290_v2, %v1238_v4  ;;  %v1240_v10 = vadd.f32 %v1239_v6, %v536_v52  ;;  %v1410_v19 = vmax.f32 %v1289_v8, 0.0 }
 0x280   :  { %v1293_v38 = vadd.f32 %v1292_v12, %v1240_v10  ;;  %v1413_v17 = vmax.f32 %v1291_v9, 0.0 }
 0x282   :  { %v1414_v20 = vmax.f32 %v1293_v38, 0.0  ;;  %v1421_v27 = vpack.c.bf16 %v1413_v17, %v1409_v22 }
 0x284   :  { %v1422_v25 = vpack.c.bf16 %v1414_v20, %v1410_v19 }
 0x286   :  { %1437 = vmatprep.subr.bf16.mxu1 %v1422_v25 }
 0x287   :  { %1438 = vmatpush1.bf16.msra.mxu1 %v1421_v27  ;;  %v2588_v27 = vld [vmem:[%s3044_s6 + $0xf8] sm:$0xff]  }
 0x288   :  { %1439 = vmatprep.subr.bf16.mxu1 %v1418_v28 }
 0x28b   :  { %1440 = vmatpush1.bf16.msra.mxu1 %v1417_v31  ;;  %v2593_v31 = vld [vmem:[%s3044_s6 + $0xb0] sm:$0xff]  }
 0x28c   :  { %2286 = vmatprep.subr.bf16.mxu1 %v2584_v30  ;;  %v2592_v30 = vld [vmem:[%s3044_s6 + $0xf0] sm:$0xff]  }
 0x28e   :  { %2238 = vmatmul.mubr.msk.bf16.vlgmr.msra.gmra.mxu1 %vm86_vm0, %v2875_v34 }
 0x28f   :  { %1467 = vmatprep.mubr.bf16.mxu1 %v2649_v24  ;;  %2287 = vmatpush3.bf16.msra.mxu1 %v2585_v32  ;;  %v2596_v32 = vld [vmem:[%s3044_s6 + $0xe8] sm:$0xff]  }
 0x290   :  { %2288 = vmatprep.subr.bf16.mxu1 %v2586_v33  ;;  %v2606_v33 = vld [vmem:[%s3044_s6 + $0x48] sm:$0xff]  }
 0x293   :  { %2289 = vmatpush3.bf16.msra.mxu1 %v2587_v40  ;;  %v2600_v40 = vld [vmem:[%s3044_s6 + $0xe0] sm:$0xff]  }
 0x294   :  { %2290 = vmatprep.subr.bf16.mxu1 %v2590_v41  ;;  %v2601_v41 = vld [vmem:[%s3044_s6 + $0xa0] sm:$0xff]  }
 0x296   :  { %2239 = vmatmul.mubr.msk.bf16.gmra.mxu1 %vm86_vm0, %v2895_v46 }
 0x297   :  { %2291 = vmatpush3.bf16.msra.mxu1 %v2591_v42  ;;  %v2604_v42 = vld [vmem:[%s3044_s6 + $0xd8] sm:$0xff]  }
 0x298   :  { %2292 = vmatprep.subr.bf16.mxu1 %v2594_v45  ;;  %v2605_v45 = vld [vmem:[%s3044_s6 + $0x98] sm:$0xff]  }
 0x29b   :  { %2293 = vmatpush3.bf16.msra.mxu1 %v2595_v47  ;;  %v2609_v47 = vld [vmem:[%s3044_s6 + $0x90] sm:$0xff]  }
 0x29c   :  { %2294 = vmatprep.subr.bf16.mxu1 %v2598_v48  ;;  %v2610_v48 = vld [vmem:[%s3044_s6 + $0x40] sm:$0xff]  }
 0x29f   :  { %2295 = vmatpush3.bf16.msra.mxu1 %v2599_v44  ;;  %v2611_v44 = vld [vmem:[%s3044_s6] sm:$0xff]  }
 0x2a0   :  { %2296 = vmatprep.subr.bf16.mxu1 %v2602_v50  ;;  %v2612_v50 = vld [vmem:[%s3044_s6 + $0xc8] sm:$0xff]  }
 0x2a3   :  { %2297 = vmatpush3.bf16.msra.mxu1 %v2603_v53  ;;  %v2613_v53 = vld [vmem:[%s3044_s6 + $0x88] sm:$0xff]  }
 0x2a4   :  { %2298 = vmatprep.subr.bf16.mxu1 %v2606_v33 }
 0x2af   :  { %v1329_v54 = vpop.f32.mrf.mxu1  ;;  %v1382_v55 = vpop.f32.mrf.mxu0 }
 0x2b0   :  { %v1330_v37 = vadd.f32 %v1329_v54, %v540_v60  ;;  %v2614_v54 = vld [vmem:[%s3044_s6 + $0xc0] sm:$0xff]  }
 0x2b1   :  { %v1331_v56 = vpop.f32.mrf.mxu1  ;;  %v1384_v57 = vpop.f32.mrf.mxu0 }
 0x2b2   :  { %v1332_v4 = vadd.f32 %v1331_v56, %v544_v59  ;;  %v1383_v18 = vadd.f32 %v1382_v55, %v1330_v37  ;;  %v2615_v55 = vld [vmem:[%s3044_s6 + $0x80] sm:$0xff]  }
 0x2b3   :  { %v1333_v13 = vpop.f32.mrf.mxu1  ;;  %v1386_v58 = vpop.f32.mrf.mxu0  ;;  %v2617_v37 = vld [vmem:[%s3046_s8] sm:$0xff]  }
 0x2b4   :  { %v1334_v6 = vadd.f32 %v1333_v13, %v540_v60  ;;  %v1385_v12 = vadd.f32 %v1384_v57, %v1332_v4  ;;  %v1403_v26 = vmax.f32 %v1383_v18, 0.0 }
 0x2b5   :  { %v1335_v14 = vpop.f32.mrf.mxu1  ;;  %v1388_v43 = vpop.f32.mrf.mxu0 }
 0x2b6   :  { %v1336_v63 = vadd.f32 %v1335_v14, %v544_v59  ;;  %v1387_v49 = vadd.f32 %v1386_v58, %v1334_v6  ;;  %v1404_v20 = vmax.f32 %v1385_v12, 0.0 }
 0x2b7   :  { %v1339_v51 = vpop.f32.mrf.mxu1  ;;  %v1392_v52 = vpop.f32.mrf.mxu0 }
 0x2b8   :  { %v1340_v1 = vadd.f32 %v1339_v51, %v540_v60  ;;  %v1389_v8 = vadd.f32 %v1388_v43, %v1336_v63  ;;  %v1407_v22 = vmax.f32 %v1387_v49, 0.0 }
 0x2b9   :  { %v1341_v61 = vpop.f32.mrf.mxu1  ;;  %v1394_v62 = vpop.f32.mrf.mxu0 }
 0x2ba   :  { %v1342_v0 = vadd.f32 %v1341_v61, %v544_v59  ;;  %v1393_v11 = vadd.f32 %v1392_v52, %v1340_v1  ;;  %v1408_v38 = vmax.f32 %v1389_v8, 0.0  ;;  %v1419_v28 = vpack.c.bf16 %v1407_v22, %v1403_v26 }
 0x2bb   :  { %v1343_v2 = vpop.f32.mrf.mxu1  ;;  %v1396_v3 = vpop.f32.mrf.mxu0 }
 0x2bc   :  { %v1344_v5 = vadd.f32 %v1343_v2, %v540_v60  ;;  %v1395_v9 = vadd.f32 %v1394_v62, %v1342_v0  ;;  %v1411_v19 = vmax.f32 %v1393_v11, 0.0  ;;  %v1420_v25 = vpack.c.bf16 %v1408_v38, %v1404_v20 }
 0x2bd   :  { %v1345_v7 = vpop.f32.mrf.mxu1  ;;  %v1398_v35 = vpop.f32.mrf.mxu0 }
 0x2be   :  { %v1397_v10 = vadd.f32 %v1396_v3, %v1344_v5  ;;  %v1346_v36 = vadd.f32 %v1345_v7, %v544_v59  ;;  %v1412_v16 = vmax.f32 %v1395_v9, 0.0 }
 0x2c0   :  { %v1399_v39 = vadd.f32 %v1398_v35, %v1346_v36  ;;  %v1415_v15 = vmax.f32 %v1397_v10, 0.0  ;;  %v2616_v36 = vld [vmem:[%s3046_s8 + $0x8] sm:$0xff]  }
 0x2c2   :  { %v1416_v17 = vmax.f32 %v1399_v39, 0.0  ;;  %v1423_v23 = vpack.c.bf16 %v1415_v15, %v1411_v19 }
 0x2c4   :  { %v1424_v21 = vpack.c.bf16 %v1416_v17, %v1412_v16  ;;  %v2242_v17 = vld [vmem:[%s3045_s7] ss:$0 sm:$0xff] }
 0x2c6   :  { %1490 = vmatprep.subr.bf16.mxu0 %v1424_v21 }
 0x2c7   :  { %1491 = vmatpush1.bf16.msra.mxu0 %v1423_v23 }
 0x2c8   :  { %1492 = vmatprep.subr.bf16.mxu0 %v1420_v25 }
 0x2cb   :  { %1493 = vmatpush1.bf16.msra.mxu0 %v1419_v28 }
 0x2cc   :  { %2314 = vmatprep.subr.bf16.mxu0 %v2588_v27 }
 0x2ce   :  { %2240 = vmatmul.mubr.msk.bf16.vlgmr.msra.gmra.mxu0 %vm86_vm0, %v2875_v34  ;;  %v2607_v34 = vld [vmem:[%s3044_s6 + $0x8] sm:$0xff]  }
 0x2cf   :  { %1520 = vmatprep.mubr.bf16.mxu0 %v2649_v24  ;;  %2315 = vmatpush3.bf16.msra.mxu0 %v2589_v29  ;;  %v2597_v24 = vld [vmem:[%s3044_s6 + $0xa8] sm:$0xff]  }
 0x2d0   :  { %2316 = vmatprep.subr.bf16.mxu0 %v2592_v30  ;;  %2299 = vmatpush3.bf16.msra.mxu1 %v2607_v34 }
 0x2d1   :  { %2300 = vmatprep.subr.bf16.mxu1 %v2610_v48 }
 0x2d3   :  { %2317 = vmatpush3.bf16.msra.mxu0 %v2593_v31 }
 0x2d4   :  { %2318 = vmatprep.subr.bf16.mxu0 %v2596_v32  ;;  %2301 = vmatpush3.bf16.msra.mxu1 %v2611_v44 }
 0x2d5   :  { %2354 = vmatprep.subr.bf16.mxu1 %v2616_v36 }
 0x2d6   :  { %2241 = vmatmul.mubr.msk.bf16.gmra.mxu0 %vm86_vm0, %v2895_v46  ;;  %v2608_v46 = vld [vmem:[%s3044_s6 + $0xd0] sm:$0xff]  }
 0x2d7   :  { %2319 = vmatpush3.bf16.msra.mxu0 %v2597_v24 }
 0x2d8   :  { %2320 = vmatprep.subr.bf16.mxu0 %v2600_v40 }
 0x2db   :  { %2321 = vmatpush3.bf16.msra.mxu0 %v2601_v41 }
 0x2dc   :  { %2322 = vmatprep.subr.bf16.mxu0 %v2604_v42 }
 0x2df   :  { %2323 = vmatpush3.bf16.msra.mxu0 %v2605_v45 }
 0x2e0   :  { %2324 = vmatprep.subr.bf16.mxu0 %v2608_v46 }
 0x2e3   :  { %2325 = vmatpush3.bf16.msra.mxu0 %v2609_v47 }
 0x2e4   :  { %2326 = vmatprep.subr.bf16.mxu0 %v2612_v50 }
 0x2e7   :  { %2327 = vmatpush3.bf16.msra.mxu0 %v2613_v53 }
 0x2e8   :  { %2328 = vmatprep.subr.bf16.mxu0 %v2614_v54 }
 0x2eb   :  { %2329 = vmatpush3.bf16.msra.mxu0 %v2615_v55 }
 0x34e   :  { %v1459_v56 = vpop.f32.mrf.mxu1 }
 0x350   :  { %v1461_v57 = vpop.f32.mrf.mxu1 }
 0x352   :  { %v1463_v13 = vpop.f32.mrf.mxu1 }
 0x353   :  { %v1531_v58 = vpack.c.bf16 %v1463_v13, %v1459_v56 }
 0x354   :  { %v1465_v14 = vpop.f32.mrf.mxu1 }
 0x355   :  { %v1532_v43 = vpack.c.bf16 %v1465_v14, %v1461_v57  ;;  %v2275_v57 = vld [vmem:[%s3047_s9] ss:$0 sm:$0xff] }
 0x356   :  { %v1469_v51 = vpop.f32.mrf.mxu1 }
 0x357   :  { %1834 = vmatprep.mubr.bf16.mxu1 %v1532_v43 }
 0x358   :  { %v1471_v52 = vpop.f32.mrf.mxu1  ;;  %1835 = vmatmul.mubr.bf16.vlgmr.msra.gmra.mxu1 %v1531_v58  ;;  %v2018_v58 = vld [vmem:[%s3049_s11] sm:$0xff] }
 0x359   :  { %2355 = vmatpush3.bf16.msra.mxu1 %v2616_v36 }
 0x35a   :  { %v1473_v59 = vpop.f32.mrf.mxu1  ;;  %2356 = vmatprep.subr.bf16.mxu1 %v2617_v37 }
 0x35b   :  { %v1535_v60 = vpack.c.bf16 %v1473_v59, %v1469_v51 }
 0x35c   :  { %v1475_v61 = vpop.f32.mrf.mxu1 }
 0x35d   :  { %v1536_v62 = vpack.c.bf16 %v1475_v61, %v1471_v52  ;;  %2357 = vmatpush3.bf16.msra.mxu1 %v2617_v37 }
 0x35f   :  { %1842 = vmatprep.mubr.bf16.mxu1 %v1536_v62 }
 0x360   :  { %1843 = vmatmul.mubr.bf16.gmra.mxu1 %v1535_v60 }
 0x38e   :  { %v1512_v63 = vpop.f32.mrf.mxu0 }
 0x390   :  { %v1514_v0 = vpop.f32.mrf.mxu0 }
 0x392   :  { %v1516_v1 = vpop.f32.mrf.mxu0 }
 0x393   :  { %v1533_v4 = vpack.c.bf16 %v1516_v1, %v1512_v63 }
 0x394   :  { %v1518_v2 = vpop.f32.mrf.mxu0 }
 0x395   :  { %v1534_v3 = vpack.c.bf16 %v1518_v2, %v1514_v0 }
 0x396   :  { %v1522_v5 = vpop.f32.mrf.mxu0 }
 0x397   :  { %1883 = vmatprep.mubr.bf16.mxu0 %v1534_v3 }
 0x398   :  { %v1524_v6 = vpop.f32.mrf.mxu0  ;;  %1884 = vmatmul.mubr.bf16.vlgmr.msra.gmra.mxu0 %v1533_v4 }
 0x39a   :  { %v1526_v7 = vpop.f32.mrf.mxu0 }
 0x39b   :  { %v1537_v10 = vpack.c.bf16 %v1526_v7, %v1522_v5 }
 0x39c   :  { %v1528_v8 = vpop.f32.mrf.mxu0 }
 0x39d   :  { %v1538_v9 = vpack.c.bf16 %v1528_v8, %v1524_v6  ;;  %v2280_v6 = vld [vmem:[%s3048_s10] ss:$0 sm:$0xff] }
 0x39f   :  { %1891 = vmatprep.mubr.bf16.mxu0 %v1538_v9 }
 0x3a0   :  { %1892 = vmatmul.mubr.bf16.gmra.mxu0 %v1537_v10 }
 0x418   :  { %v2302_v11 = vpop.f32.mrf.mxu1 }
 0x41a   :  { %v2303_v35 = vpop.f32.mrf.mxu1 }
 0x41b   :  { %v2304_v16 = vadd.f32 %v2303_v35, %v2302_v11 }
 0x41c   :  { %v2305_v12 = vpop.f32.mrf.mxu1 }
 0x41d   :  { %v1837_v23 = vadd.f32 %v2304_v16, %v2242_v17 }
 0x41e   :  { %v2306_v39 = vpop.f32.mrf.mxu1 }
 0x41f   :  { %v2307_v19 = vadd.f32 %v2306_v39, %v2305_v12 }
 0x420   :  { %v2308_v49 = vpop.f32.mrf.mxu1 }
 0x421   :  { %v1840_v26 = vadd.f32 %v2307_v19, %v2242_v17 }
 0x422   :  { %v2309_v38 = vpop.f32.mrf.mxu1 }
 0x423   :  { %v2310_v31 = vadd.f32 %v2309_v38, %v2308_v49 }
 0x424   :  { %v2311_v22 = vpop.f32.mrf.mxu1 }
 0x425   :  { %v1845_v45 = vadd.f32 %v2310_v31, %v2242_v17 }
 0x426   :  { %v2312_v29 = vpop.f32.mrf.mxu1 }
 0x427   :  { %v2313_v40 = vadd.f32 %v2312_v29, %v2311_v22 }
 0x429   :  { %v1848_v48 = vadd.f32 %v2313_v40, %v2242_v17 }
 0x458   :  { %v2330_v15 = vpop.f32.mrf.mxu0 }
 0x45a   :  { %v2331_v18 = vpop.f32.mrf.mxu0 }
 0x45b   :  { %v2332_v20 = vadd.f32 %v2331_v18, %v2330_v15 }
 0x45c   :  { %v2333_v21 = vpop.f32.mrf.mxu0 }
 0x45d   :  { %v1886_v27 = vadd.f32 %v2332_v20, %v1837_v23 }
 0x45e   :  { %v2334_v25 = vpop.f32.mrf.mxu0 }
 0x45f   :  { %v2335_v28 = vadd.f32 %v2334_v25, %v2333_v21  ;;  %v1900_v34 = vmax.f32 %v1886_v27, 0.0 }
 0x460   :  { %v2336_v30 = vpop.f32.mrf.mxu0 }
 0x461   :  { %v1889_v32 = vadd.f32 %v2335_v28, %v1840_v26 }
 0x462   :  { %v2337_v33 = vpop.f32.mrf.mxu0 }
 0x463   :  { %v1901_v24 = vmax.f32 %v1889_v32, 0.0  ;;  %v2338_v41 = vadd.f32 %v2337_v33, %v2336_v30 }
 0x464   :  { %v2339_v42 = vpop.f32.mrf.mxu0 }
 0x465   :  { %v1904_v46 = vpack.c.bf16 %v1901_v24, %v1900_v34  ;;  %v1894_v44 = vadd.f32 %v2338_v41, %v1845_v45 }
 0x466   :  { %v2340_v47 = vpop.f32.mrf.mxu0 }
 0x467   :  { %v2341_v50 = vadd.f32 %v2340_v47, %v2339_v42  ;;  %2358 = vmatprep.mubr.msk.bf16.mxu1 %vm86_vm0, %v1904_v46  ;;  %v1902_v54 = vmax.f32 %v1894_v44, 0.0  ;;  %v2008_v46 = vstv %s3050_s12 }
 0x469   :  { %v1897_v53 = vadd.f32 %v2341_v50, %v1848_v48 }
 0x46b   :  { %v1903_v55 = vmax.f32 %v1897_v53, 0.0  ;;  %v2067_v53 = vstv %s3051_s13 }
 0x46d   :  { %v1905_v56 = vpack.c.bf16 %v1903_v55, %v1902_v54 }
 0x46f   :  { %2359 = vmatmul.mubr.msk.bf16.vlgmr.msra.gmra.mxu1 %vm86_vm0, %v1905_v56 }
 0x52f   :  { %v2360_v13 = vpop.f32.mrf.mxu1 }
 0x530   :  { %v1978_v14 = vadd.f32 %v2360_v13, %v2275_v57 }
 0x531   :  { %v1969_v43 = vpop.f32.mrf.mxu1 }
 0x532   :  { %v2021_v51 = vmul.f32 %v2018_v58, %v1978_v14  ;;  %v1970_v52 = vadd.f32 %v2275_v57, %v1969_v43  ;;  %v1993_v12 = vmul.f32 %v2280_v6, %v1978_v14 }
 0x533   :  { %v2361_v59 = vpop.f32.mrf.mxu1 }
 0x534   :  { %v2037_v60 = vsel %vm86_vm0, %v2021_v51, 0.0  ;;  %v2019_v61 = vmul.f32 %v2018_v58, %v1970_v52  ;;  %v1981_v62 = vadd.f32 %v2361_v59, %v2275_v57  ;;  %v2001_v19 = vsel %vm86_vm0, %v1993_v12, 0.0 }
 0x535   :  { %v2038_v63 = vrot.slane %v2037_v60, 4  ;;  %v1972_v0 = vpop.f32.mrf.mxu1  ;;  %v1991_v40 = vmul.f32 %v2280_v6, %v1970_v52 }
 0x536   :  { %v2023_v1 = vsel %vm86_vm0, %v2019_v61, 0.0  ;;  %v2022_v2 = vmul.f32 %v2018_v58, %v1981_v62  ;;  %v1973_v3 = vadd.f32 %v2275_v57, %v1972_v0  ;;  %v1994_v42 = vmul.f32 %v2280_v6, %v1981_v62 }
 0x537   :  { %v2039_v4 = vadd.f32 %v2038_v63, %v2037_v60  ;;  %v2024_v5 = vrot.slane %v2023_v1, 4  ;;  %v1995_v41 = vsel %vm86_vm0, %v1991_v40, 0.0 }
 0x538   :  { %v2044_v7 = vsel %vm86_vm0, %v2022_v2, 0.0  ;;  %v2020_v8 = vmul.f32 %v2018_v58, %v1973_v3  ;;  %v1992_v9 = vmul.f32 %v2280_v6, %v1973_v3  ;;  %v2004_v45 = vsel %vm86_vm0, %v1994_v42, 0.0 }
 0x539   :  { %v2025_v10 = vadd.f32 %v2024_v5, %v2023_v1  ;;  %v2045_v36 = vrot.slane %v2044_v7, 4  ;;  %v2040_v37 = vrot.slane %v2039_v4, 2 }
 0x53a   :  { %v2030_v11 = vsel %vm86_vm0, %v2020_v8, 0.0  ;;  %v1998_v35 = vsel %vm86_vm0, %v1992_v9, 0.0 }
 0x53b   :  { %v2026_v39 = vrot.slane %v2025_v10, 2  ;;  %v2046_v49 = vadd.f32 %v2045_v36, %v2044_v7  ;;  %v2031_v15 = vrot.slane %v2030_v11, 4  ;;  %1999 = vadd.xlane.f32.xlu1 %v1998_v35  ;;  %v2041_v18 = vadd.f32 %v2040_v37, %v2039_v4 }
 0x53d   :  { %v2027_v38 = vadd.f32 %v2026_v39, %v2025_v10  ;;  %v2047_v16 = vrot.slane %v2046_v49, 2  ;;  %v2032_v17 = vadd.f32 %v2031_v15, %v2030_v11  ;;  %v2042_v25 = vrot.slane %v2041_v18, 1 }
 0x53f   :  { %v2033_v20 = vrot.slane %v2032_v17, 2  ;;  %2002 = vadd.xlane.f32.xlu1 %v2001_v19  ;;  %v2048_v21 = vadd.f32 %v2047_v16, %v2046_v49  ;;  %v2028_v22 = vrot.slane %v2027_v38, 1  ;;  %v2043_v30 = vadd.f32 %v2042_v25, %v2041_v18 }
 0x541   :  { %v2034_v23 = vadd.f32 %v2033_v20, %v2032_v17  ;;  %v2049_v27 = vrot.slane %v2048_v21, 1  ;;  %v2029_v28 = vadd.f32 %v2028_v22, %v2027_v38 }
 0x543   :  { %v2035_v26 = vrot.slane %v2034_v23, 1  ;;  %v2050_v31 = vadd.f32 %v2049_v27, %v2048_v21 }
 0x545   :  { %v2036_v29 = vadd.f32 %v2035_v26, %v2034_v23 }
 0x547   :  { %v2056_v32 = vsel %vm2055_vm2, %v2036_v29, %v2029_v28 }
 0x548   :  { %v2058_v33 = vsel %vm2057_vm3, %v2043_v30, %v2056_v32 }
 0x549   :  { %v2060_v34 = vsel %vm2059_vm4, %v2050_v31, %v2058_v33 }
 0x54a   :  { %v2063_v24 = vsel %vm2062_vm5, %v2060_v34, 0.0 }
 0x54b   :  { %2064 = vadd.xlane.f32.xlu0 %v2063_v24 }
 0x54f   :  { %1996 = vadd.xlane.f32.xlu0 %v1995_v41 }
 0x553   :  { %2005 = vadd.xlane.f32.xlu0 %v2004_v45 }
 0x5c4   :  { %v2000_v47 = vpop.xlane.xlu1 %1999 }
 0x5c5   :  { %v2010_v48 = vadd.f32 %v2008_v46, %v2000_v47 }
 0x5c7   :  { %2015 = vst.msk [vmem:[%s3052_s14 + $0x8] sm:$0xff] %vm2013_vm6, %v2010_v48 }
 0x5c8   :  { %v2003_v44 = vpop.xlane.xlu1 %2002 }
 0x5c9   :  { %v2011_v50 = vadd.f32 %v2008_v46, %v2003_v44 }
 0x5cb   :  { %2016 = vst.msk [vmem:[%s3052_s14 + $0x10] sm:$0xff] %vm2013_vm6, %v2011_v50 }
 0x5d4   :  { %v2065_v54 = vpop.xlane.xlu0 %2064 }
 0x5d5   :  { %v2068_v55 = vadd.f32 %v2067_v53, %v2065_v54 }
 0x5d7   :  { %v2281_v56 = vmul.f32 -1.442695, %v2068_v55 }
 0x5d8   :  { %v1997_v57 = vpop.xlane.xlu0 %1996 }
 0x5d9   :  { %2618 = vpow2.f32 %v2281_v56  ;;  %v2009_v13 = vadd.f32 %v2008_v46, %v1997_v57 }
 0x5db   :  { %2014 = vst.msk [vmem:[%s3052_s14] sm:$0xff] %vm2013_vm6, %v2009_v13 }
 0x5dc   :  { %v2006_v58 = vpop.xlane.xlu0 %2005 }
 0x5dd   :  { %v2012_v14 = vadd.f32 %v2008_v46, %v2006_v58 }
 0x5df   :  { %2017 = vst.msk [vmem:[%s3052_s14 + $0x18] sm:$0xff] %vm2013_vm6, %v2012_v14 }
 0x5e6   :  { %v2619_v43 = vpop.eup %2618 }
 0x5e7   :  { %v2072_v51 = vadd.f32 1.0, %v2619_v43 }
 0x5e9   :  { %2620 = vrcp.f32 %v2072_v51 }
 0x5f6   :  { %v2621_v52 = vpop.eup %2620 }
 0x5f7   :  { %2076 = vst.msk [vmem:[%s3053_s15] sm:$0xf] %vm2075_vm7, %v2621_v52 }
 0x5f8   :  { %2085 = vsyncpa [#allocation5], 1 }

</bundles_post_ra>
